<compile_context>
chip_gen: v7x
topology: tpu7x:2x2x1
jax: 0.10.0
libtpu: 0.0.40
codegen_flags: <defaults>
</compile_context>

<pallas_src>
import functools

import jax
import jax.numpy as jnp
import numpy as np
from jax.experimental import pallas as pl
from jax.experimental.pallas import tpu as pltpu


def encoder_kernel(x_ref,        # (Bq, Tq, N)       input block (batch-major)
                   attn_ref,     # (Bq, N)           precomputed softmax attention
                   wih_ref,      # (N, 4*Hp)         input gate weight, per-gate padded
                   whh_ref,      # (Hp, 4*Hp)        recurrent gate weight, per-gate padded
                   b_ref,        # (1, 4*Hp)         fused LSTM bias, per-gate padded
                   out_w_ref,    # (Bq, Tq, N)       input_weighted block
                   out_e_ref,    # (Bq, Tq, Hp)      input_encoded block (H padded)
                   h_scr,        # (Bq, Hp) VMEM     persistent hidden state
                   c_scr,        # (Bq, Hp) VMEM     persistent cell state
                   pre_scr):     # (Bq, Tq, 4Hp) VMEM hoisted input projection
    Bq, Tq, N = x_ref.shape
    Hp = h_scr.shape[1]
    mm_dtype = whh_ref.dtype     # matmul operand dtype (f32 or bf16)

    # Reset the recurrent state at the first time block of each batch block.
    @pl.when(pl.program_id(1) == 0)
    def _init():
        h_scr[...] = jnp.zeros_like(h_scr)
        c_scr[...] = jnp.zeros_like(c_scr)

    x_blk = x_ref[...]                               # (Bq, Tq, N)
    attn = attn_ref[...]                             # (Bq, N), rows sum to 1

    # Attention-weighted inputs for the WHOLE block: one VPU multiply, one block
    # store (no per-step masked 4-lane vst on the serial path).
    w_in_blk = x_blk * attn[:, None, :]              # (Bq, Tq, N), f32
    out_w_ref[...] = w_in_blk.astype(out_w_ref.dtype)

    # Hoisted input projection for all Tq steps: ONE MXU matmul per block.
    # (Bq*Tq, N) @ (N, 4Hp) + bias  ->  VMEM scratch (keeps vreg pressure low).
    pre_flat = jnp.dot(w_in_blk.reshape(Bq * Tq, N).astype(mm_dtype),
                       wih_ref[...],
                       preferred_element_type=jnp.float32) + b_ref[...]
    pre_scr[...] = pre_flat.reshape(Bq, Tq, 4 * Hp)

    # Hoisted loop-invariant weight load.
    w_hh = whh_ref[...]                              # (Hp, 4Hp)

    # Keep the state in vregs across the unrolled steps; touch scratch once.
    h = h_scr[...]
    c = c_scr[...]

    # Static (unrolled) time loop: per step only  h @ W_hh + pre[t]  + LSTM cell.
    for tt in range(Tq):
        gates = jnp.dot(h.astype(mm_dtype), w_hh,
                        preferred_element_type=jnp.float32) + pre_scr[:, tt, :]
        # PyTorch LSTM gate order i, f, g, o; each gate padded to Hp columns so the
        # slices are 128-lane aligned (padded lanes stay exactly zero).
        i_g = jax.nn.sigmoid(gates[:, 0 * Hp:1 * Hp])
        f_g = jax.nn.sigmoid(gates[:, 1 * Hp:2 * Hp])
        g_g = jnp.tanh(gates[:, 2 * Hp:3 * Hp])
        o_g = jax.nn.sigmoid(gates[:, 3 * Hp:4 * Hp])
        c = f_g * c + i_g * g_g
        h = o_g * jnp.tanh(c)
        out_e_ref[:, tt, :] = h.astype(out_e_ref.dtype)   # lane-dense (Hp) store

    h_scr[...] = h
    c_scr[...] = c


def _round_up(x, m):
    return ((x + m - 1) // m) * m


@functools.partial(jax.jit,
                   static_argnames=("hidden_size", "block_t", "block_b",
                                    "matmul_dtype"))
def encoder_forward(input_data, w_ih, w_hh, b_ih, b_hh, attn_w, attn_b,
                    *, hidden_size, block_t=64, block_b=None,
                    matmul_dtype="float32"):
    """input_data: (B, T-1, N) float32. Returns (input_weighted, input_encoded)."""
    B, Tm1, N = input_data.shape
    H = hidden_size
    Hp = _round_up(H, 128)                 # lane-aligned gates + lane-dense out_e
    mm_dtype = jnp.dtype(matmul_dtype)

    # Time tile: as large as requested but never over-padding tiny sequences;
    # must be a multiple of 8 for the (8,128) sublane rule on the (Tq, N) tile.
    Tq = _round_up(min(block_t, _round_up(Tm1, 8)), 8)
    Tp = _round_up(Tm1, Tq)

    Bq = B if block_b is None else block_b
    assert B % Bq == 0
    # (8,128) rule for the (Bq, N) attention tile: either full batch or >= 8 rows.
    assert Bq == B or Bq % 8 == 0

    x = input_data.astype(jnp.float32)

    # Attention is state-invariant: softmax(w_h.h + w_c.c + bias + w_x.x) ==
    # softmax(w_x.x). Compute the weights once, exactly, in f32.
    w_x = attn_w[0, 2 * H:2 * H + Tm1].astype(jnp.float32)
    s_x = jnp.einsum("btn,t->bn", x, w_x) + attn_b.astype(jnp.float32)
    attn = jax.nn.softmax(s_x, axis=1)                      # (B, N)

    # LSTM gate weights with each gate padded to Hp columns (padded columns/bias
    # are zero so padded state lanes stay exactly zero).
    wih_t = w_ih.T.astype(jnp.float32)        # (N, 4H)
    whh_t = w_hh.T.astype(jnp.float32)        # (H, 4H)
    b_l = (b_ih + b_hh).astype(jnp.float32)   # (4H,)
    w_ih_g = jnp.zeros((N, 4 * Hp), jnp.float32)
    w_hh_g = jnp.zeros((Hp, 4 * Hp), jnp.float32)
    b_gate = jnp.zeros((1, 4 * Hp), jnp.float32)
    for k in range(4):
        w_ih_g = w_ih_g.at[:, k * Hp:k * Hp + H].set(wih_t[:, k * H:(k + 1) * H])
        w_hh_g = w_hh_g.at[0:H, k * Hp:k * Hp + H].set(whh_t[:, k * H:(k + 1) * H])
        b_gate = b_gate.at[0, k * Hp:k * Hp + H].set(b_l[k * H:(k + 1) * H])
    # bf16 weights on v6e/v7x double MXU throughput and halve weight VMEM;
    # accumulation stays f32 (preferred_element_type) and all state math is f32.
    w_ih_g = w_ih_g.astype(mm_dtype)
    w_hh_g = w_hh_g.astype(mm_dtype)

    # Zero-pad the time axis; padded steps run after all real steps (state only
    # flows forward) and their outputs are sliced away below.
    x_p = jnp.pad(x, ((0, 0), (0, Tp - Tm1), (0, 0)))

    grid = (B // Bq, Tp // Tq)

    out_w, out_e = pl.pallas_call(
        encoder_kernel,
        out_shape=(jax.ShapeDtypeStruct((B, Tp, N), jnp.float32),
                   jax.ShapeDtypeStruct((B, Tp, Hp), jnp.float32)),
        grid=grid,
        in_specs=[
            pl.BlockSpec((Bq, Tq, N), lambda b, t: (b, t, 0)),       # x
            pl.BlockSpec((Bq, N), lambda b, t: (b, 0)),              # attn weights
            pl.BlockSpec((N, 4 * Hp), lambda b, t: (0, 0)),          # W_ih (gates)
            pl.BlockSpec((Hp, 4 * Hp), lambda b, t: (0, 0)),         # W_hh (gates)
            pl.BlockSpec((1, 4 * Hp), lambda b, t: (0, 0)),          # fused bias
        ],
        out_specs=(
            pl.BlockSpec((Bq, Tq, N), lambda b, t: (b, t, 0)),
            pl.BlockSpec((Bq, Tq, Hp), lambda b, t: (b, t, 0)),
        ),
        scratch_shapes=[
            pltpu.VMEM((Bq, Hp), jnp.float32),            # hidden state
            pltpu.VMEM((Bq, Hp), jnp.float32),            # cell state
            pltpu.VMEM((Bq, Tq, 4 * Hp), jnp.float32),    # hoisted input projection
        ],
        compiler_params=pltpu.CompilerParams(
            dimension_semantics=("parallel", "arbitrary")),
    )(x_p, attn, w_ih_g, w_hh_g, b_gate)

    # Strip time/hidden padding; outputs are already batch-major (no transpose).
    input_weighted = out_w[:, :Tm1, :]
    input_encoded = out_e[:, :Tm1, :H]
    return input_weighted, input_encoded


def encoder_reference(x, w_ih, w_hh, b_ih, b_hh, attn_w, attn_b, H):
    """Pure-JAX replica of the PyTorch forward for verification."""
    B, Tm1, N = x.shape
    h = jnp.zeros((B, H), jnp.float32)
    c = jnp.zeros((B, H), jnp.float32)
    out_w, out_e = [], []
    for t in range(Tm1):
        hc = jnp.broadcast_to(h[:, None, :], (B, N, H))
        cc = jnp.broadcast_to(c[:, None, :], (B, N, H))
        xp = jnp.transpose(x, (0, 2, 1))                        # (B, N, T-1)
        cat = jnp.concatenate([hc, cc, xp], axis=2)             # (B, N, 2H+T-1)
        e = cat.reshape(-1, 2 * H + Tm1) @ attn_w.T + attn_b    # (B*N, 1)
        attn = jax.nn.softmax(e.reshape(B, N), axis=1)
        w_in = attn * x[:, t, :]
        gates = w_in @ w_ih.T + h @ w_hh.T + b_ih + b_hh
        i_g = jax.nn.sigmoid(gates[:, 0 * H:1 * H])
        f_g = jax.nn.sigmoid(gates[:, 1 * H:2 * H])
        g_g = jnp.tanh(gates[:, 2 * H:3 * H])
        o_g = jax.nn.sigmoid(gates[:, 3 * H:4 * H])
        c = f_g * c + i_g * g_g
        h = o_g * jnp.tanh(c)
        out_w.append(w_in)
        out_e.append(h)
    return jnp.stack(out_w, axis=1), jnp.stack(out_e, axis=1)


if __name__ == "__main__":
    # Small shapes consistent with the module defaults: input_size=4 factors,
    # T=10 time steps (T-1=9 recurrent steps), hidden=32, batch=2.
    B, N, T, H = 2, 4, 10, 32
    Tm1 = T - 1

    key = jax.random.PRNGKey(0)
    k_x, k1, k2, k3, k4, k5, k6 = jax.random.split(key, 7)

    # Deterministic parameter init (PyTorch-style uniform(-1/sqrt(fan), 1/sqrt(fan))).
    s_lstm = 1.0 / np.sqrt(H)
    w_ih = jax.random.uniform(k1, (4 * H, N), jnp.float32, -s_lstm, s_lstm)
    w_hh = jax.random.uniform(k2, (4 * H, H), jnp.float32, -s_lstm, s_lstm)
    b_ih = jax.random.uniform(k3, (4 * H,), jnp.float32, -s_lstm, s_lstm)
    b_hh = jax.random.uniform(k4, (4 * H,), jnp.float32, -s_lstm, s_lstm)

    attn_in = 2 * H + Tm1
    s_attn = 1.0 / np.sqrt(attn_in)
    attn_w = jax.random.uniform(k5, (1, attn_in), jnp.float32, -s_attn, s_attn)
    attn_b = jax.random.uniform(k6, (1,), jnp.float32, -s_attn, s_attn)

    x = jax.random.normal(k_x, (B, Tm1, N), jnp.float32)

    iw_ref, ie_ref = encoder_reference(x, w_ih, w_hh, b_ih, b_hh,
                                       attn_w, attn_b, H)

    # 1) f32 matmul path, small time tile => 2 time blocks (exercises the
    #    cross-block hidden/cell-state carry). Tight tolerance.
    iw, ie = encoder_forward(x, w_ih, w_hh, b_ih, b_hh, attn_w, attn_b,
                             hidden_size=H, block_t=8, matmul_dtype="float32")
    iw, ie = jax.block_until_ready((iw, ie))
    assert iw.shape == (B, Tm1, N) and ie.shape == (B, Tm1, H)
    np.testing.assert_allclose(np.asarray(iw), np.asarray(iw_ref),
                               rtol=2e-3, atol=2e-3)
    np.testing.assert_allclose(np.asarray(ie), np.asarray(ie_ref),
                               rtol=2e-3, atol=2e-3)

    # 2) bf16 matmul operands (v6e/v7x fast path), default (large) time tile =>
    #    single time block. Looser tolerance for the bf16 gate matmuls.
    iw_b, ie_b = encoder_forward(x, w_ih, w_hh, b_ih, b_hh, attn_w, attn_b,
                                 hidden_size=H, matmul_dtype="bfloat16")
    iw_b, ie_b = jax.block_until_ready((iw_b, ie_b))
    assert iw_b.shape == (B, Tm1, N) and ie_b.shape == (B, Tm1, H)
    np.testing.assert_allclose(np.asarray(iw_b), np.asarray(iw_ref),
                               rtol=2e-3, atol=2e-3)      # out_w stays f32
    np.testing.assert_allclose(np.asarray(ie_b), np.asarray(ie_ref),
                               rtol=2e-2, atol=2e-2)

    print("KERNEL_OK")
</pallas_src>

<mosaic_0001>
module attributes {stable_mosaic.version = 11 : i64} {
  func.func @encoder_kernel(%arg0: i32, %arg1: i32, %arg2: memref<2x8x4xf32, #tpu.memory_space<vmem>>, %arg3: memref<2x4xf32, #tpu.memory_space<vmem>>, %arg4: memref<4x512xf32, #tpu.memory_space<vmem>>, %arg5: memref<128x512xf32, #tpu.memory_space<vmem>>, %arg6: memref<1x512xf32, #tpu.memory_space<vmem>>, %arg7: memref<2x8x4xf32, #tpu.memory_space<vmem>>, %arg8: memref<2x8x128xf32, #tpu.memory_space<vmem>>, %arg9: memref<2x128xf32, #tpu.memory_space<vmem>>, %arg10: memref<2x128xf32, #tpu.memory_space<vmem>>, %arg11: memref<2x8x512xf32, #tpu.memory_space<vmem>>) attributes {dimension_semantics = [#tpu.dimension_semantics<parallel>, #tpu.dimension_semantics<arbitrary>], iteration_bounds = array<i64: 1, 2>, scalar_prefetch = 0 : i64, scratch_operands = 3 : i64, tpu.core_type = #tpu.core_type<tc>, window_params = [{transform_indices = @transform_0, window_bounds = array<i64: 2, 8, 4>}, {transform_indices = @transform_1, window_bounds = array<i64: 2, 4>}, {pipeline_mode = #tpu.pipeline_mode<synchronous>, transform_indices = @transform_2, window_bounds = array<i64: 4, 512>}, {pipeline_mode = #tpu.pipeline_mode<synchronous>, transform_indices = @transform_3, window_bounds = array<i64: 128, 512>}, {pipeline_mode = #tpu.pipeline_mode<synchronous>, transform_indices = @transform_4, window_bounds = array<i64: 1, 512>}, {transform_indices = @transform_5, window_bounds = array<i64: 2, 8, 4>}, {transform_indices = @transform_6, window_bounds = array<i64: 2, 8, 128>}]} {
    %c0_i32 = arith.constant 0 : i32
    %0 = arith.cmpi eq, %arg1, %c0_i32 : i32
    %1 = arith.extui %0 : i1 to i32
    %c0_i32_0 = arith.constant 0 : i32
    %2 = arith.cmpi ne, %1, %c0_i32_0 : i32
    scf.if %2 {
      %cst_98 = arith.constant 0.000000e+00 : f32
      %278 = vector.broadcast %cst_98 : f32 to vector<2x128xf32>
      %c0_99 = arith.constant 0 : index
      %c0_100 = arith.constant 0 : index
      %279 = vector.load %arg9[%c0_99, %c0_100] : memref<2x128xf32, #tpu.memory_space<vmem>>, vector<2x128xf32>
      tpu.vector_store %arg9[%c0_99, %c0_100], %278 {strides = array<i32>} : memref<2x128xf32, #tpu.memory_space<vmem>>, vector<2x128xf32>,
      %cst_101 = arith.constant 0.000000e+00 : f32
      %280 = vector.broadcast %cst_101 : f32 to vector<2x128xf32>
      %c0_102 = arith.constant 0 : index
      %c0_103 = arith.constant 0 : index
      %281 = vector.load %arg10[%c0_102, %c0_103] : memref<2x128xf32, #tpu.memory_space<vmem>>, vector<2x128xf32>
      tpu.vector_store %arg10[%c0_102, %c0_103], %280 {strides = array<i32>} : memref<2x128xf32, #tpu.memory_space<vmem>>, vector<2x128xf32>,
    } else {
    }
    %c0 = arith.constant 0 : index
    %c0_1 = arith.constant 0 : index
    %c0_2 = arith.constant 0 : index
    %3 = vector.load %arg2[%c0, %c0_1, %c0_2] : memref<2x8x4xf32, #tpu.memory_space<vmem>>, vector<2x8x4xf32>
    %c0_3 = arith.constant 0 : index
    %c0_4 = arith.constant 0 : index
    %4 = vector.load %arg3[%c0_3, %c0_4] : memref<2x4xf32, #tpu.memory_space<vmem>>, vector<2x4xf32>
    %5 = vector.shape_cast %4 : vector<2x4xf32> to vector<2x1x4xf32>
    %6 = vector.broadcast %5 : vector<2x1x4xf32> to vector<2x8x4xf32>
    %7 = arith.mulf %3, %6 : vector<2x8x4xf32>
    %c0_5 = arith.constant 0 : index
    %c0_6 = arith.constant 0 : index
    %c0_7 = arith.constant 0 : index
    %8 = vector.load %arg7[%c0_5, %c0_6, %c0_7] : memref<2x8x4xf32, #tpu.memory_space<vmem>>, vector<2x8x4xf32>
    tpu.vector_store %arg7[%c0_5, %c0_6, %c0_7], %7 {strides = array<i32>} : memref<2x8x4xf32, #tpu.memory_space<vmem>>, vector<2x8x4xf32>,
    %9 = vector.shape_cast %7 : vector<2x8x4xf32> to vector<16x4xf32>
    %c0_8 = arith.constant 0 : index
    %c0_9 = arith.constant 0 : index
    %10 = vector.load %arg4[%c0_8, %c0_9] : memref<4x512xf32, #tpu.memory_space<vmem>>, vector<4x512xf32>
    %cst = arith.constant dense<0.000000e+00> : vector<16x512xf32>
    %11 = tpu.matmul %9, %10, %cst {dimension_numbers = #tpu.dot_dimension_numbers<[1], [0], [0], [1], [0, 0, 1, 1], [], []>} : vector<16x4xf32>, vector<4x512xf32>, vector<16x512xf32> -> vector<16x512xf32>
    %c0_10 = arith.constant 0 : index
    %c0_11 = arith.constant 0 : index
    %12 = vector.load %arg6[%c0_10, %c0_11] : memref<1x512xf32, #tpu.memory_space<vmem>>, vector<1x512xf32>
    %13 = vector.broadcast %12 : vector<1x512xf32> to vector<16x512xf32>
    %14 = arith.addf %11, %13 : vector<16x512xf32>
    %15 = vector.shape_cast %14 : vector<16x512xf32> to vector<2x8x512xf32>
    %c0_12 = arith.constant 0 : index
    %c0_13 = arith.constant 0 : index
    %c0_14 = arith.constant 0 : index
    %16 = vector.load %arg11[%c0_12, %c0_13, %c0_14] : memref<2x8x512xf32, #tpu.memory_space<vmem>>, vector<2x8x512xf32>
    tpu.vector_store %arg11[%c0_12, %c0_13, %c0_14], %15 {strides = array<i32>} : memref<2x8x512xf32, #tpu.memory_space<vmem>>, vector<2x8x512xf32>,
    %c0_15 = arith.constant 0 : index
    %c0_16 = arith.constant 0 : index
    %17 = vector.load %arg5[%c0_15, %c0_16] : memref<128x512xf32, #tpu.memory_space<vmem>>, vector<128x512xf32>
    %c0_17 = arith.constant 0 : index
    %c0_18 = arith.constant 0 : index
    %18 = vector.load %arg9[%c0_17, %c0_18] : memref<2x128xf32, #tpu.memory_space<vmem>>, vector<2x128xf32>
    %c0_19 = arith.constant 0 : index
    %c0_20 = arith.constant 0 : index
    %19 = vector.load %arg10[%c0_19, %c0_20] : memref<2x128xf32, #tpu.memory_space<vmem>>, vector<2x128xf32>
    %cst_21 = arith.constant dense<0.000000e+00> : vector<2x512xf32>
    %20 = tpu.matmul %18, %17, %cst_21 {dimension_numbers = #tpu.dot_dimension_numbers<[1], [0], [0], [1], [0, 0, 1, 1], [], []>} : vector<2x128xf32>, vector<128x512xf32>, vector<2x512xf32> -> vector<2x512xf32>
    %c0_22 = arith.constant 0 : index
    %c0_23 = arith.constant 0 : index
    %c0_24 = arith.constant 0 : index
    %21 = vector.load %arg11[%c0_22, %c0_23, %c0_24] : memref<2x8x512xf32, #tpu.memory_space<vmem>>, vector<2x1x512xf32>
    %22 = vector.shape_cast %21 : vector<2x1x512xf32> to vector<2x512xf32>
    %23 = arith.addf %20, %22 : vector<2x512xf32>
    %24 = vector.extract_strided_slice %23 {offsets = [0, 0], sizes = [2, 128], strides = [1, 1]} : vector<2x512xf32> to vector<2x128xf32>
    %25 = arith.negf %24 : vector<2x128xf32>
    %26 = math.exp %25 : vector<2x128xf32>
    %cst_25 = arith.constant 1.000000e+00 : f32
    %27 = vector.broadcast %cst_25 : f32 to vector<2x128xf32>
    %28 = arith.addf %27, %26 : vector<2x128xf32>
    %29 = arith.divf %27, %28 : vector<2x128xf32>
    %30 = vector.extract_strided_slice %23 {offsets = [0, 128], sizes = [2, 128], strides = [1, 1]} : vector<2x512xf32> to vector<2x128xf32>
    %31 = arith.negf %30 : vector<2x128xf32>
    %32 = math.exp %31 : vector<2x128xf32>
    %cst_26 = arith.constant 1.000000e+00 : f32
    %33 = vector.broadcast %cst_26 : f32 to vector<2x128xf32>
    %34 = arith.addf %33, %32 : vector<2x128xf32>
    %35 = arith.divf %33, %34 : vector<2x128xf32>
    %36 = vector.extract_strided_slice %23 {offsets = [0, 256], sizes = [2, 128], strides = [1, 1]} : vector<2x512xf32> to vector<2x128xf32>
    %37 = math.tanh %36 : vector<2x128xf32>
    %38 = vector.extract_strided_slice %23 {offsets = [0, 384], sizes = [2, 128], strides = [1, 1]} : vector<2x512xf32> to vector<2x128xf32>
    %39 = arith.negf %38 : vector<2x128xf32>
    %40 = math.exp %39 : vector<2x128xf32>
    %cst_27 = arith.constant 1.000000e+00 : f32
    %41 = vector.broadcast %cst_27 : f32 to vector<2x128xf32>
    %42 = arith.addf %41, %40 : vector<2x128xf32>
    %43 = arith.divf %41, %42 : vector<2x128xf32>
    %44 = arith.mulf %35, %19 : vector<2x128xf32>
    %45 = arith.mulf %29, %37 : vector<2x128xf32>
    %46 = arith.addf %44, %45 : vector<2x128xf32>
    %47 = math.tanh %46 : vector<2x128xf32>
    %48 = arith.mulf %43, %47 : vector<2x128xf32>
    %c0_28 = arith.constant 0 : index
    %c0_29 = arith.constant 0 : index
    %c0_30 = arith.constant 0 : index
    %49 = vector.load %arg8[%c0_28, %c0_29, %c0_30] : memref<2x8x128xf32, #tpu.memory_space<vmem>>, vector<2x1x128xf32>
    %50 = vector.shape_cast %49 : vector<2x1x128xf32> to vector<2x128xf32>
    %51 = vector.shape_cast %48 : vector<2x128xf32> to vector<2x1x128xf32>
    tpu.vector_store %arg8[%c0_28, %c0_29, %c0_30], %51 {strides = array<i32>} : memref<2x8x128xf32, #tpu.memory_space<vmem>>, vector<2x1x128xf32>,
    %cst_31 = arith.constant dense<0.000000e+00> : vector<2x512xf32>
    %52 = tpu.matmul %48, %17, %cst_31 {dimension_numbers = #tpu.dot_dimension_numbers<[1], [0], [0], [1], [0, 0, 1, 1], [], []>} : vector<2x128xf32>, vector<128x512xf32>, vector<2x512xf32> -> vector<2x512xf32>
    %c0_32 = arith.constant 0 : index
    %c1 = arith.constant 1 : index
    %c0_33 = arith.constant 0 : index
    %53 = vector.load %arg11[%c0_32, %c1, %c0_33] : memref<2x8x512xf32, #tpu.memory_space<vmem>>, vector<2x1x512xf32>
    %54 = vector.shape_cast %53 : vector<2x1x512xf32> to vector<2x512xf32>
    %55 = arith.addf %52, %54 : vector<2x512xf32>
    %56 = vector.extract_strided_slice %55 {offsets = [0, 0], sizes = [2, 128], strides = [1, 1]} : vector<2x512xf32> to vector<2x128xf32>
    %57 = arith.negf %56 : vector<2x128xf32>
    %58 = math.exp %57 : vector<2x128xf32>
    %cst_34 = arith.constant 1.000000e+00 : f32
    %59 = vector.broadcast %cst_34 : f32 to vector<2x128xf32>
    %60 = arith.addf %59, %58 : vector<2x128xf32>
    %61 = arith.divf %59, %60 : vector<2x128xf32>
    %62 = vector.extract_strided_slice %55 {offsets = [0, 128], sizes = [2, 128], strides = [1, 1]} : vector<2x512xf32> to vector<2x128xf32>
    %63 = arith.negf %62 : vector<2x128xf32>
    %64 = math.exp %63 : vector<2x128xf32>
    %cst_35 = arith.constant 1.000000e+00 : f32
    %65 = vector.broadcast %cst_35 : f32 to vector<2x128xf32>
    %66 = arith.addf %65, %64 : vector<2x128xf32>
    %67 = arith.divf %65, %66 : vector<2x128xf32>
    %68 = vector.extract_strided_slice %55 {offsets = [0, 256], sizes = [2, 128], strides = [1, 1]} : vector<2x512xf32> to vector<2x128xf32>
    %69 = math.tanh %68 : vector<2x128xf32>
    %70 = vector.extract_strided_slice %55 {offsets = [0, 384], sizes = [2, 128], strides = [1, 1]} : vector<2x512xf32> to vector<2x128xf32>
    %71 = arith.negf %70 : vector<2x128xf32>
    %72 = math.exp %71 : vector<2x128xf32>
    %cst_36 = arith.constant 1.000000e+00 : f32
    %73 = vector.broadcast %cst_36 : f32 to vector<2x128xf32>
    %74 = arith.addf %73, %72 : vector<2x128xf32>
    %75 = arith.divf %73, %74 : vector<2x128xf32>
    %76 = arith.mulf %67, %46 : vector<2x128xf32>
    %77 = arith.mulf %61, %69 : vector<2x128xf32>
    %78 = arith.addf %76, %77 : vector<2x128xf32>
    %79 = math.tanh %78 : vector<2x128xf32>
    %80 = arith.mulf %75, %79 : vector<2x128xf32>
    %c0_37 = arith.constant 0 : index
    %c1_38 = arith.constant 1 : index
    %c0_39 = arith.constant 0 : index
    %81 = vector.load %arg8[%c0_37, %c1_38, %c0_39] : memref<2x8x128xf32, #tpu.memory_space<vmem>>, vector<2x1x128xf32>
    %82 = vector.shape_cast %81 : vector<2x1x128xf32> to vector<2x128xf32>
    %83 = vector.shape_cast %80 : vector<2x128xf32> to vector<2x1x128xf32>
    tpu.vector_store %arg8[%c0_37, %c1_38, %c0_39], %83 {strides = array<i32>} : memref<2x8x128xf32, #tpu.memory_space<vmem>>, vector<2x1x128xf32>,
    %cst_40 = arith.constant dense<0.000000e+00> : vector<2x512xf32>
    %84 = tpu.matmul %80, %17, %cst_40 {dimension_numbers = #tpu.dot_dimension_numbers<[1], [0], [0], [1], [0, 0, 1, 1], [], []>} : vector<2x128xf32>, vector<128x512xf32>, vector<2x512xf32> -> vector<2x512xf32>
    %c0_41 = arith.constant 0 : index
    %c2 = arith.constant 2 : index
    %c0_42 = arith.constant 0 : index
    %85 = vector.load %arg11[%c0_41, %c2, %c0_42] : memref<2x8x512xf32, #tpu.memory_space<vmem>>, vector<2x1x512xf32>
    %86 = vector.shape_cast %85 : vector<2x1x512xf32> to vector<2x512xf32>
    %87 = arith.addf %84, %86 : vector<2x512xf32>
    %88 = vector.extract_strided_slice %87 {offsets = [0, 0], sizes = [2, 128], strides = [1, 1]} : vector<2x512xf32> to vector<2x128xf32>
    %89 = arith.negf %88 : vector<2x128xf32>
    %90 = math.exp %89 : vector<2x128xf32>
    %cst_43 = arith.constant 1.000000e+00 : f32
    %91 = vector.broadcast %cst_43 : f32 to vector<2x128xf32>
    %92 = arith.addf %91, %90 : vector<2x128xf32>
    %93 = arith.divf %91, %92 : vector<2x128xf32>
    %94 = vector.extract_strided_slice %87 {offsets = [0, 128], sizes = [2, 128], strides = [1, 1]} : vector<2x512xf32> to vector<2x128xf32>
    %95 = arith.negf %94 : vector<2x128xf32>
    %96 = math.exp %95 : vector<2x128xf32>
    %cst_44 = arith.constant 1.000000e+00 : f32
    %97 = vector.broadcast %cst_44 : f32 to vector<2x128xf32>
    %98 = arith.addf %97, %96 : vector<2x128xf32>
    %99 = arith.divf %97, %98 : vector<2x128xf32>
    %100 = vector.extract_strided_slice %87 {offsets = [0, 256], sizes = [2, 128], strides = [1, 1]} : vector<2x512xf32> to vector<2x128xf32>
    %101 = math.tanh %100 : vector<2x128xf32>
    %102 = vector.extract_strided_slice %87 {offsets = [0, 384], sizes = [2, 128], strides = [1, 1]} : vector<2x512xf32> to vector<2x128xf32>
    %103 = arith.negf %102 : vector<2x128xf32>
    %104 = math.exp %103 : vector<2x128xf32>
    %cst_45 = arith.constant 1.000000e+00 : f32
    %105 = vector.broadcast %cst_45 : f32 to vector<2x128xf32>
    %106 = arith.addf %105, %104 : vector<2x128xf32>
    %107 = arith.divf %105, %106 : vector<2x128xf32>
    %108 = arith.mulf %99, %78 : vector<2x128xf32>
    %109 = arith.mulf %93, %101 : vector<2x128xf32>
    %110 = arith.addf %108, %109 : vector<2x128xf32>
    %111 = math.tanh %110 : vector<2x128xf32>
    %112 = arith.mulf %107, %111 : vector<2x128xf32>
    %c0_46 = arith.constant 0 : index
    %c2_47 = arith.constant 2 : index
    %c0_48 = arith.constant 0 : index
    %113 = vector.load %arg8[%c0_46, %c2_47, %c0_48] : memref<2x8x128xf32, #tpu.memory_space<vmem>>, vector<2x1x128xf32>
    %114 = vector.shape_cast %113 : vector<2x1x128xf32> to vector<2x128xf32>
    %115 = vector.shape_cast %112 : vector<2x128xf32> to vector<2x1x128xf32>
    tpu.vector_store %arg8[%c0_46, %c2_47, %c0_48], %115 {strides = array<i32>} : memref<2x8x128xf32, #tpu.memory_space<vmem>>, vector<2x1x128xf32>,
    %cst_49 = arith.constant dense<0.000000e+00> : vector<2x512xf32>
    %116 = tpu.matmul %112, %17, %cst_49 {dimension_numbers = #tpu.dot_dimension_numbers<[1], [0], [0], [1], [0, 0, 1, 1], [], []>} : vector<2x128xf32>, vector<128x512xf32>, vector<2x512xf32> -> vector<2x512xf32>
    %c0_50 = arith.constant 0 : index
    %c3 = arith.constant 3 : index
    %c0_51 = arith.constant 0 : index
    %117 = vector.load %arg11[%c0_50, %c3, %c0_51] : memref<2x8x512xf32, #tpu.memory_space<vmem>>, vector<2x1x512xf32>
    %118 = vector.shape_cast %117 : vector<2x1x512xf32> to vector<2x512xf32>
    %119 = arith.addf %116, %118 : vector<2x512xf32>
    %120 = vector.extract_strided_slice %119 {offsets = [0, 0], sizes = [2, 128], strides = [1, 1]} : vector<2x512xf32> to vector<2x128xf32>
    %121 = arith.negf %120 : vector<2x128xf32>
    %122 = math.exp %121 : vector<2x128xf32>
    %cst_52 = arith.constant 1.000000e+00 : f32
    %123 = vector.broadcast %cst_52 : f32 to vector<2x128xf32>
    %124 = arith.addf %123, %122 : vector<2x128xf32>
    %125 = arith.divf %123, %124 : vector<2x128xf32>
    %126 = vector.extract_strided_slice %119 {offsets = [0, 128], sizes = [2, 128], strides = [1, 1]} : vector<2x512xf32> to vector<2x128xf32>
    %127 = arith.negf %126 : vector<2x128xf32>
    %128 = math.exp %127 : vector<2x128xf32>
    %cst_53 = arith.constant 1.000000e+00 : f32
    %129 = vector.broadcast %cst_53 : f32 to vector<2x128xf32>
    %130 = arith.addf %129, %128 : vector<2x128xf32>
    %131 = arith.divf %129, %130 : vector<2x128xf32>
    %132 = vector.extract_strided_slice %119 {offsets = [0, 256], sizes = [2, 128], strides = [1, 1]} : vector<2x512xf32> to vector<2x128xf32>
    %133 = math.tanh %132 : vector<2x128xf32>
    %134 = vector.extract_strided_slice %119 {offsets = [0, 384], sizes = [2, 128], strides = [1, 1]} : vector<2x512xf32> to vector<2x128xf32>
    %135 = arith.negf %134 : vector<2x128xf32>
    %136 = math.exp %135 : vector<2x128xf32>
    %cst_54 = arith.constant 1.000000e+00 : f32
    %137 = vector.broadcast %cst_54 : f32 to vector<2x128xf32>
    %138 = arith.addf %137, %136 : vector<2x128xf32>
    %139 = arith.divf %137, %138 : vector<2x128xf32>
    %140 = arith.mulf %131, %110 : vector<2x128xf32>
    %141 = arith.mulf %125, %133 : vector<2x128xf32>
    %142 = arith.addf %140, %141 : vector<2x128xf32>
    %143 = math.tanh %142 : vector<2x128xf32>
    %144 = arith.mulf %139, %143 : vector<2x128xf32>
    %c0_55 = arith.constant 0 : index
    %c3_56 = arith.constant 3 : index
    %c0_57 = arith.constant 0 : index
    %145 = vector.load %arg8[%c0_55, %c3_56, %c0_57] : memref<2x8x128xf32, #tpu.memory_space<vmem>>, vector<2x1x128xf32>
    %146 = vector.shape_cast %145 : vector<2x1x128xf32> to vector<2x128xf32>
    %147 = vector.shape_cast %144 : vector<2x128xf32> to vector<2x1x128xf32>
    tpu.vector_store %arg8[%c0_55, %c3_56, %c0_57], %147 {strides = array<i32>} : memref<2x8x128xf32, #tpu.memory_space<vmem>>, vector<2x1x128xf32>,
    %cst_58 = arith.constant dense<0.000000e+00> : vector<2x512xf32>
    %148 = tpu.matmul %144, %17, %cst_58 {dimension_numbers = #tpu.dot_dimension_numbers<[1], [0], [0], [1], [0, 0, 1, 1], [], []>} : vector<2x128xf32>, vector<128x512xf32>, vector<2x512xf32> -> vector<2x512xf32>
    %c0_59 = arith.constant 0 : index
    %c4 = arith.constant 4 : index
    %c0_60 = arith.constant 0 : index
    %149 = vector.load %arg11[%c0_59, %c4, %c0_60] : memref<2x8x512xf32, #tpu.memory_space<vmem>>, vector<2x1x512xf32>
    %150 = vector.shape_cast %149 : vector<2x1x512xf32> to vector<2x512xf32>
    %151 = arith.addf %148, %150 : vector<2x512xf32>
    %152 = vector.extract_strided_slice %151 {offsets = [0, 0], sizes = [2, 128], strides = [1, 1]} : vector<2x512xf32> to vector<2x128xf32>
    %153 = arith.negf %152 : vector<2x128xf32>
    %154 = math.exp %153 : vector<2x128xf32>
    %cst_61 = arith.constant 1.000000e+00 : f32
    %155 = vector.broadcast %cst_61 : f32 to vector<2x128xf32>
    %156 = arith.addf %155, %154 : vector<2x128xf32>
    %157 = arith.divf %155, %156 : vector<2x128xf32>
    %158 = vector.extract_strided_slice %151 {offsets = [0, 128], sizes = [2, 128], strides = [1, 1]} : vector<2x512xf32> to vector<2x128xf32>
    %159 = arith.negf %158 : vector<2x128xf32>
    %160 = math.exp %159 : vector<2x128xf32>
    %cst_62 = arith.constant 1.000000e+00 : f32
    %161 = vector.broadcast %cst_62 : f32 to vector<2x128xf32>
    %162 = arith.addf %161, %160 : vector<2x128xf32>
    %163 = arith.divf %161, %162 : vector<2x128xf32>
    %164 = vector.extract_strided_slice %151 {offsets = [0, 256], sizes = [2, 128], strides = [1, 1]} : vector<2x512xf32> to vector<2x128xf32>
    %165 = math.tanh %164 : vector<2x128xf32>
    %166 = vector.extract_strided_slice %151 {offsets = [0, 384], sizes = [2, 128], strides = [1, 1]} : vector<2x512xf32> to vector<2x128xf32>
    %167 = arith.negf %166 : vector<2x128xf32>
    %168 = math.exp %167 : vector<2x128xf32>
    %cst_63 = arith.constant 1.000000e+00 : f32
    %169 = vector.broadcast %cst_63 : f32 to vector<2x128xf32>
    %170 = arith.addf %169, %168 : vector<2x128xf32>
    %171 = arith.divf %169, %170 : vector<2x128xf32>
    %172 = arith.mulf %163, %142 : vector<2x128xf32>
    %173 = arith.mulf %157, %165 : vector<2x128xf32>
    %174 = arith.addf %172, %173 : vector<2x128xf32>
    %175 = math.tanh %174 : vector<2x128xf32>
    %176 = arith.mulf %171, %175 : vector<2x128xf32>
    %c0_64 = arith.constant 0 : index
    %c4_65 = arith.constant 4 : index
    %c0_66 = arith.constant 0 : index
    %177 = vector.load %arg8[%c0_64, %c4_65, %c0_66] : memref<2x8x128xf32, #tpu.memory_space<vmem>>, vector<2x1x128xf32>
    %178 = vector.shape_cast %177 : vector<2x1x128xf32> to vector<2x128xf32>
    %179 = vector.shape_cast %176 : vector<2x128xf32> to vector<2x1x128xf32>
    tpu.vector_store %arg8[%c0_64, %c4_65, %c0_66], %179 {strides = array<i32>} : memref<2x8x128xf32, #tpu.memory_space<vmem>>, vector<2x1x128xf32>,
    %cst_67 = arith.constant dense<0.000000e+00> : vector<2x512xf32>
    %180 = tpu.matmul %176, %17, %cst_67 {dimension_numbers = #tpu.dot_dimension_numbers<[1], [0], [0], [1], [0, 0, 1, 1], [], []>} : vector<2x128xf32>, vector<128x512xf32>, vector<2x512xf32> -> vector<2x512xf32>
    %c0_68 = arith.constant 0 : index
    %c5 = arith.constant 5 : index
    %c0_69 = arith.constant 0 : index
    %181 = vector.load %arg11[%c0_68, %c5, %c0_69] : memref<2x8x512xf32, #tpu.memory_space<vmem>>, vector<2x1x512xf32>
    %182 = vector.shape_cast %181 : vector<2x1x512xf32> to vector<2x512xf32>
    %183 = arith.addf %180, %182 : vector<2x512xf32>
    %184 = vector.extract_strided_slice %183 {offsets = [0, 0], sizes = [2, 128], strides = [1, 1]} : vector<2x512xf32> to vector<2x128xf32>
    %185 = arith.negf %184 : vector<2x128xf32>
    %186 = math.exp %185 : vector<2x128xf32>
    %cst_70 = arith.constant 1.000000e+00 : f32
    %187 = vector.broadcast %cst_70 : f32 to vector<2x128xf32>
    %188 = arith.addf %187, %186 : vector<2x128xf32>
    %189 = arith.divf %187, %188 : vector<2x128xf32>
    %190 = vector.extract_strided_slice %183 {offsets = [0, 128], sizes = [2, 128], strides = [1, 1]} : vector<2x512xf32> to vector<2x128xf32>
    %191 = arith.negf %190 : vector<2x128xf32>
    %192 = math.exp %191 : vector<2x128xf32>
    %cst_71 = arith.constant 1.000000e+00 : f32
    %193 = vector.broadcast %cst_71 : f32 to vector<2x128xf32>
    %194 = arith.addf %193, %192 : vector<2x128xf32>
    %195 = arith.divf %193, %194 : vector<2x128xf32>
    %196 = vector.extract_strided_slice %183 {offsets = [0, 256], sizes = [2, 128], strides = [1, 1]} : vector<2x512xf32> to vector<2x128xf32>
    %197 = math.tanh %196 : vector<2x128xf32>
    %198 = vector.extract_strided_slice %183 {offsets = [0, 384], sizes = [2, 128], strides = [1, 1]} : vector<2x512xf32> to vector<2x128xf32>
    %199 = arith.negf %198 : vector<2x128xf32>
    %200 = math.exp %199 : vector<2x128xf32>
    %cst_72 = arith.constant 1.000000e+00 : f32
    %201 = vector.broadcast %cst_72 : f32 to vector<2x128xf32>
    %202 = arith.addf %201, %200 : vector<2x128xf32>
    %203 = arith.divf %201, %202 : vector<2x128xf32>
    %204 = arith.mulf %195, %174 : vector<2x128xf32>
    %205 = arith.mulf %189, %197 : vector<2x128xf32>
    %206 = arith.addf %204, %205 : vector<2x128xf32>
    %207 = math.tanh %206 : vector<2x128xf32>
    %208 = arith.mulf %203, %207 : vector<2x128xf32>
    %c0_73 = arith.constant 0 : index
    %c5_74 = arith.constant 5 : index
    %c0_75 = arith.constant 0 : index
    %209 = vector.load %arg8[%c0_73, %c5_74, %c0_75] : memref<2x8x128xf32, #tpu.memory_space<vmem>>, vector<2x1x128xf32>
    %210 = vector.shape_cast %209 : vector<2x1x128xf32> to vector<2x128xf32>
    %211 = vector.shape_cast %208 : vector<2x128xf32> to vector<2x1x128xf32>
    tpu.vector_store %arg8[%c0_73, %c5_74, %c0_75], %211 {strides = array<i32>} : memref<2x8x128xf32, #tpu.memory_space<vmem>>, vector<2x1x128xf32>,
    %cst_76 = arith.constant dense<0.000000e+00> : vector<2x512xf32>
    %212 = tpu.matmul %208, %17, %cst_76 {dimension_numbers = #tpu.dot_dimension_numbers<[1], [0], [0], [1], [0, 0, 1, 1], [], []>} : vector<2x128xf32>, vector<128x512xf32>, vector<2x512xf32> -> vector<2x512xf32>
    %c0_77 = arith.constant 0 : index
    %c6 = arith.constant 6 : index
    %c0_78 = arith.constant 0 : index
    %213 = vector.load %arg11[%c0_77, %c6, %c0_78] : memref<2x8x512xf32, #tpu.memory_space<vmem>>, vector<2x1x512xf32>
    %214 = vector.shape_cast %213 : vector<2x1x512xf32> to vector<2x512xf32>
    %215 = arith.addf %212, %214 : vector<2x512xf32>
    %216 = vector.extract_strided_slice %215 {offsets = [0, 0], sizes = [2, 128], strides = [1, 1]} : vector<2x512xf32> to vector<2x128xf32>
    %217 = arith.negf %216 : vector<2x128xf32>
    %218 = math.exp %217 : vector<2x128xf32>
    %cst_79 = arith.constant 1.000000e+00 : f32
    %219 = vector.broadcast %cst_79 : f32 to vector<2x128xf32>
    %220 = arith.addf %219, %218 : vector<2x128xf32>
    %221 = arith.divf %219, %220 : vector<2x128xf32>
    %222 = vector.extract_strided_slice %215 {offsets = [0, 128], sizes = [2, 128], strides = [1, 1]} : vector<2x512xf32> to vector<2x128xf32>
    %223 = arith.negf %222 : vector<2x128xf32>
    %224 = math.exp %223 : vector<2x128xf32>
    %cst_80 = arith.constant 1.000000e+00 : f32
    %225 = vector.broadcast %cst_80 : f32 to vector<2x128xf32>
    %226 = arith.addf %225, %224 : vector<2x128xf32>
    %227 = arith.divf %225, %226 : vector<2x128xf32>
    %228 = vector.extract_strided_slice %215 {offsets = [0, 256], sizes = [2, 128], strides = [1, 1]} : vector<2x512xf32> to vector<2x128xf32>
    %229 = math.tanh %228 : vector<2x128xf32>
    %230 = vector.extract_strided_slice %215 {offsets = [0, 384], sizes = [2, 128], strides = [1, 1]} : vector<2x512xf32> to vector<2x128xf32>
    %231 = arith.negf %230 : vector<2x128xf32>
    %232 = math.exp %231 : vector<2x128xf32>
    %cst_81 = arith.constant 1.000000e+00 : f32
    %233 = vector.broadcast %cst_81 : f32 to vector<2x128xf32>
    %234 = arith.addf %233, %232 : vector<2x128xf32>
    %235 = arith.divf %233, %234 : vector<2x128xf32>
    %236 = arith.mulf %227, %206 : vector<2x128xf32>
    %237 = arith.mulf %221, %229 : vector<2x128xf32>
    %238 = arith.addf %236, %237 : vector<2x128xf32>
    %239 = math.tanh %238 : vector<2x128xf32>
    %240 = arith.mulf %235, %239 : vector<2x128xf32>
    %c0_82 = arith.constant 0 : index
    %c6_83 = arith.constant 6 : index
    %c0_84 = arith.constant 0 : index
    %241 = vector.load %arg8[%c0_82, %c6_83, %c0_84] : memref<2x8x128xf32, #tpu.memory_space<vmem>>, vector<2x1x128xf32>
    %242 = vector.shape_cast %241 : vector<2x1x128xf32> to vector<2x128xf32>
    %243 = vector.shape_cast %240 : vector<2x128xf32> to vector<2x1x128xf32>
    tpu.vector_store %arg8[%c0_82, %c6_83, %c0_84], %243 {strides = array<i32>} : memref<2x8x128xf32, #tpu.memory_space<vmem>>, vector<2x1x128xf32>,
    %cst_85 = arith.constant dense<0.000000e+00> : vector<2x512xf32>
    %244 = tpu.matmul %240, %17, %cst_85 {dimension_numbers = #tpu.dot_dimension_numbers<[1], [0], [0], [1], [0, 0, 1, 1], [], []>} : vector<2x128xf32>, vector<128x512xf32>, vector<2x512xf32> -> vector<2x512xf32>
    %c0_86 = arith.constant 0 : index
    %c7 = arith.constant 7 : index
    %c0_87 = arith.constant 0 : index
    %245 = vector.load %arg11[%c0_86, %c7, %c0_87] : memref<2x8x512xf32, #tpu.memory_space<vmem>>, vector<2x1x512xf32>
    %246 = vector.shape_cast %245 : vector<2x1x512xf32> to vector<2x512xf32>
    %247 = arith.addf %244, %246 : vector<2x512xf32>
    %248 = vector.extract_strided_slice %247 {offsets = [0, 0], sizes = [2, 128], strides = [1, 1]} : vector<2x512xf32> to vector<2x128xf32>
    %249 = arith.negf %248 : vector<2x128xf32>
    %250 = math.exp %249 : vector<2x128xf32>
    %cst_88 = arith.constant 1.000000e+00 : f32
    %251 = vector.broadcast %cst_88 : f32 to vector<2x128xf32>
    %252 = arith.addf %251, %250 : vector<2x128xf32>
    %253 = arith.divf %251, %252 : vector<2x128xf32>
    %254 = vector.extract_strided_slice %247 {offsets = [0, 128], sizes = [2, 128], strides = [1, 1]} : vector<2x512xf32> to vector<2x128xf32>
    %255 = arith.negf %254 : vector<2x128xf32>
    %256 = math.exp %255 : vector<2x128xf32>
    %cst_89 = arith.constant 1.000000e+00 : f32
    %257 = vector.broadcast %cst_89 : f32 to vector<2x128xf32>
    %258 = arith.addf %257, %256 : vector<2x128xf32>
    %259 = arith.divf %257, %258 : vector<2x128xf32>
    %260 = vector.extract_strided_slice %247 {offsets = [0, 256], sizes = [2, 128], strides = [1, 1]} : vector<2x512xf32> to vector<2x128xf32>
    %261 = math.tanh %260 : vector<2x128xf32>
    %262 = vector.extract_strided_slice %247 {offsets = [0, 384], sizes = [2, 128], strides = [1, 1]} : vector<2x512xf32> to vector<2x128xf32>
    %263 = arith.negf %262 : vector<2x128xf32>
    %264 = math.exp %263 : vector<2x128xf32>
    %cst_90 = arith.constant 1.000000e+00 : f32
    %265 = vector.broadcast %cst_90 : f32 to vector<2x128xf32>
    %266 = arith.addf %265, %264 : vector<2x128xf32>
    %267 = arith.divf %265, %266 : vector<2x128xf32>
    %268 = arith.mulf %259, %238 : vector<2x128xf32>
    %269 = arith.mulf %253, %261 : vector<2x128xf32>
    %270 = arith.addf %268, %269 : vector<2x128xf32>
    %271 = math.tanh %270 : vector<2x128xf32>
    %272 = arith.mulf %267, %271 : vector<2x128xf32>
    %c0_91 = arith.constant 0 : index
    %c7_92 = arith.constant 7 : index
    %c0_93 = arith.constant 0 : index
    %273 = vector.load %arg8[%c0_91, %c7_92, %c0_93] : memref<2x8x128xf32, #tpu.memory_space<vmem>>, vector<2x1x128xf32>
    %274 = vector.shape_cast %273 : vector<2x1x128xf32> to vector<2x128xf32>
    %275 = vector.shape_cast %272 : vector<2x128xf32> to vector<2x1x128xf32>
    tpu.vector_store %arg8[%c0_91, %c7_92, %c0_93], %275 {strides = array<i32>} : memref<2x8x128xf32, #tpu.memory_space<vmem>>, vector<2x1x128xf32>,
    %c0_94 = arith.constant 0 : index
    %c0_95 = arith.constant 0 : index
    %276 = vector.load %arg9[%c0_94, %c0_95] : memref<2x128xf32, #tpu.memory_space<vmem>>, vector<2x128xf32>
    tpu.vector_store %arg9[%c0_94, %c0_95], %272 {strides = array<i32>} : memref<2x128xf32, #tpu.memory_space<vmem>>, vector<2x128xf32>,
    %c0_96 = arith.constant 0 : index
    %c0_97 = arith.constant 0 : index
    %277 = vector.load %arg10[%c0_96, %c0_97] : memref<2x128xf32, #tpu.memory_space<vmem>>, vector<2x128xf32>
    tpu.vector_store %arg10[%c0_96, %c0_97], %270 {strides = array<i32>} : memref<2x128xf32, #tpu.memory_space<vmem>>, vector<2x128xf32>,
    return
  }
  func.func @transform_0(%arg0: i32, %arg1: i32) -> (i32, i32, i32) {
    %c0_i32 = arith.constant 0 : i32
    %c0_i32_0 = arith.constant 0 : i32
    return %arg0, %arg1, %c0_i32 : i32, i32, i32
  }
  func.func @transform_1(%arg0: i32, %arg1: i32) -> (i32, i32) {
    %c0_i32 = arith.constant 0 : i32
    %c0_i32_0 = arith.constant 0 : i32
    return %arg0, %c0_i32 : i32, i32
  }
  func.func @transform_2(%arg0: i32, %arg1: i32) -> (i32, i32) {
    %c0_i32 = arith.constant 0 : i32
    %c0_i32_0 = arith.constant 0 : i32
    %c0_i32_1 = arith.constant 0 : i32
    return %c0_i32, %c0_i32_0 : i32, i32
  }
  func.func @transform_3(%arg0: i32, %arg1: i32) -> (i32, i32) {
    %c0_i32 = arith.constant 0 : i32
    %c0_i32_0 = arith.constant 0 : i32
    %c0_i32_1 = arith.constant 0 : i32
    return %c0_i32, %c0_i32_0 : i32, i32
  }
  func.func @transform_4(%arg0: i32, %arg1: i32) -> (i32, i32) {
    %c0_i32 = arith.constant 0 : i32
    %c0_i32_0 = arith.constant 0 : i32
    %c0_i32_1 = arith.constant 0 : i32
    return %c0_i32, %c0_i32_0 : i32, i32
  }
  func.func @transform_5(%arg0: i32, %arg1: i32) -> (i32, i32, i32) {
    %c0_i32 = arith.constant 0 : i32
    %c0_i32_0 = arith.constant 0 : i32
    return %arg0, %arg1, %c0_i32 : i32, i32, i32
  }
  func.func @transform_6(%arg0: i32, %arg1: i32) -> (i32, i32, i32) {
    %c0_i32 = arith.constant 0 : i32
    %c0_i32_0 = arith.constant 0 : i32
    return %arg0, %arg1, %c0_i32 : i32, i32, i32
  }
}

</mosaic_0001>

<bundles_post_ra>
// kernel: encoder_forward.1
= control target key start
LH: loop header
LB: loop body
LE: loop exit
PB: predicated region body
PF: predicated region fallthrough
CT: control target
= control target key end

     0   :  { %s3515_s21 = smov 0   ;;  %s3517_s22 = smov 0   ;;  %s4255_s0 = inlined_call_operand.vmem [shape: f32[2,16,4], index: 0, kind: input, shape index: {}]   ;;  %s4256_s1 = inlined_call_operand.vmem [shape: f32[2,4], index: 1, kind: input, shape index: {}]   ;;  %s4257_s2 = inlined_call_operand.vmem [shape: f32[4,512], index: 2, kind: input, shape index: {}]   ;;  %s4258_s3 = inlined_call_operand.vmem [shape: f32[128,512], index: 3, kind: input, shape index: {}]   ;;  %s4259_s4 = inlined_call_operand.vmem [shape: f32[1,512], index: 4, kind: input, shape index: {}]   ;;  %s4260_s5 = inlined_call_operand.vmem [shape: f32[2,16,4], index: 5, kind: output, shape index: {0}]   ;;  %s4261_s6 = inlined_call_operand.vmem [shape: f32[2,16,128], index: 6, kind: output, shape index: {1}]  }
   0x1   :  { %s3519_s23 = smov 0   ;;  %s3521_s24 = smov 0  }
   0x2   :  { %s3523_s25 = smov 0  }
   0x3 LB: > { %s26_s26 = sadd.s32 1, %s3471_s24  ;;  %s2685_s27 = sadd.s32 4294967295, %s3475_s25   ;;  %s3475_s25 = sphi %s3523_s25, %s17_s25   ;;  %s3471_s24 = sphi %s3521_s24, %s4266_s24   ;;  %s3467_s23 = sphi %s3519_s23, %s4265_s23   ;;  %s3463_s22 = sphi %s3517_s22, %s4264_s22   ;;  %s3459_s21 = sphi %s3515_s21, %s4263_s21  }
   0x4   : > { %p27_p0 = scmp.ge.s32.totalorder %s26_s26, 2  ;;  %p45_p1 = scmp.ne.s32.totalorder %s3463_s22, %s3459_s21 }
   0x5   : > { %p46_p2 = scmp.eq.s32.totalorder %s3475_s25, 0  ;;  %p166_p4 = scmp.eq.s32.totalorder %s2685_s27, 1 }
   0x6   : > { %s4268_s26 = smov (%p27_p0, %s26_s26), 0  ;;  %s38_s29 = sadd.s32 1, %s3463_s22 }
   0x7   : > { %p47_p3 = por %p46_p2, %p45_p1  ;;  %s34_s28 = ssub.s32 %s3471_s24, %s4268_s26 }
   0x8   : > { %p36_p5 = scmp.eq.s32.totalorder %s34_s28, 0  ;;  %p3550_p6 = por %p166_p4, %p45_p1 }
   0x9   : > { %p2689_p7 = scmp.ge.s32.totalorder %s3475_s25, 2 }
   0xa   : > { %s3555_s7 = scalar_select %p36_p5, %s3463_s22, %s38_s29  }
   0xb   : > { %232 = sbr.rel (%p2689_p7) target bundleno = 25 (0x19), region = 32 }
  0x12   : > { %235 = sbr.rel (!%p47_p3) target bundleno = 25 (0x19), region = 36  ;;  %s237_s8 = sand.u32 (%p47_p3), 1, %s3463_s22  }
  0x13   : > { %s2691_s9 = sshll.u32 (%p47_p3), %s3471_s24, 3  ;;  %s2690_s10 = sshll.u32 (%p47_p3), %s237_s8, 4 }
  0x14   : > { %s244_s13 = scalar_lea.vmem (%p47_p3), %s4255_s0, %s2691_s9  ;;  %s239_s14 = scalar_lea.vmem (%p47_p3), [#allocation5], %s2690_s10 }
  0x15   : > { %v274_v0 = vld [vmem:[%s244_s13] sm:$0xff] (%p47_p3)  ;;  %v276_v1 = vld [vmem:[%s244_s13 + $0x10] sm:$0xff] (%p47_p3) }
  0x16   : > { %275 = vst [vmem:[%s239_s14] sm:$0xff] (%p47_p3), %v274_v0  ;;  %277 = vst [vmem:[%s239_s14 + $0x8] sm:$0xff] (%p47_p3), %v276_v1 }
  0x19 PF: > { %p2692_p8 = scmp.ge.s32.totalorder %s3475_s25, 1  ;;  %p282_p9 = scmp.lt.s32.totalorder %s3475_s25, 3 }
  0x1b   : > { %p283_p10 = pnand %p2692_p8, %p282_p9 }
  0x1c   : > { %s289_s15 = sand.u32 (!%p283_p10), 1, %s3459_s21   ;;  %p2696_p11 = scmp.ne.s32.totalorder (!%p283_p10), %s3467_s23, 0 }
  0x1d   : > { %286 = sbr.rel (%p283_p10) target bundleno = 2166 (0x876), region = 74  ;;  %s3566_s16 = sshll.u32 (!%p283_p10), %s289_s15, 4 }
  0x1e   : > { %s291_s17 = scalar_lea.vmem (!%p283_p10), [#allocation5], %s3566_s16  ;;  %s3570_s18 = scalar_lea.vmem (!%p283_p10), [#allocation6], %s3566_s16 }
  0x1f   : > { %s3573_s19 = scalar_lea.vmem (!%p283_p10), [#allocation7], %s3566_s16 }
  0x24   : > { %335 = sbr.rel (%p2696_p11) target bundleno = 43 (0x2b), region = 82  ;;  %v3477_v2 = vmov (!%p2696_p11), 0.0  }
  0x25   : > { %336 = vst [vmem:[#allocation2] sm:$0x3] (!%p2696_p11), %v3477_v2  ;;  %337 = vst [vmem:[#allocation3] sm:$0x3] (!%p2696_p11), %v3477_v2 }
  0x2b PF: > { %v379_v3 = vld [vmem:[%s4257_s2] sm:$0xff]  ;;  %vm413_vm0 = vcmask 1043456   ;;  %v380_v4 = vld [vmem:[%s4257_s2 + $0x8] sm:$0xff]  ;;  %v353_v6 = vlaneseq  ;;  %v3478_v9 = vmov 0.0   ;;  %v587_v11 = vld [vmem:[%s4258_s3 + $0x18] sm:$0xff]  ;;  %vm376_vm1 = vcmask 31744  }
  0x2c   : > { %v585_v5 = vld [vmem:[%s4258_s3 + $0x8] sm:$0xff]  ;;  %v405_v7 = vcombine.high %v379_v3, %v379_v3  ;;  %v406_v8 = vcombine.high %v380_v4, %v380_v4  ;;  %486 = vmatprep.mubr.f32.mxu0 %v3478_v9  ;;  %563 = vmatprep.mubr.f32.mxu1 %v3478_v9  ;;  %v591_v12 = vld [vmem:[%s4258_s3 + $0x38] sm:$0xff]  ;;  %v3479_v15 = vmov 1966171168   ;;  %v584_v23 = vld [vmem:[%s4258_s3] sm:$0xff] }
  0x2d   : > { %v589_v10 = vld [vmem:[%s4258_s3 + $0x28] sm:$0xff]  ;;  %v3598_v14 = vpack.c.bf16 %v591_v12, %v587_v11  ;;  %v351_v16 = vunpack.c.l.s4 %v3479_v15  ;;  %v3600_v17 = vshrl.u32 %v353_v6, 7  ;;  %v2697_v18 = vld.sshfl [vmem:[%s4256_s1] sm:$0x11 pattern:$0x75316420] }
  0x2e   : > { %v3596_v13 = vpack.c.bf16 %v589_v10, %v585_v5  ;;  %2698 = vmatprep.subr.msk.mxu0 %vm413_vm0, %v405_v7  ;;  %2702 = vmatprep.subr.msk.mxu1 %vm413_vm0, %v406_v8  ;;  %v349_v20 = vcombine.high %v2697_v18, %v2697_v18  ;;  %v588_v25 = vld [vmem:[%s4258_s3 + $0x20] sm:$0xff]  ;;  %v586_v26 = vld [vmem:[%s4258_s3 + $0x10] sm:$0xff]  ;;  %v593_v30 = vld [vmem:[%s4258_s3 + $0x48] sm:$0xff] }
  0x2f   : > { %2699 = vmatpush1.msk.msra.mxu0 %vm413_vm0, %v379_v3  ;;  %2703 = vmatpush1.msk.msra.mxu1 %vm413_vm0, %v380_v4  ;;  %v352_v19 = vunpack.c.0.s8 %v351_v16  ;;  %v3615_v22 = vsub.s32 0, %v3600_v17  ;;  %v590_v27 = vld [vmem:[%s4258_s3 + $0x30] sm:$0xff]  ;;  %v597_v33 = vld [vmem:[%s4258_s3 + $0x68] sm:$0xff]  ;;  %v595_v34 = vld [vmem:[%s4258_s3 + $0x58] sm:$0xff]  ;;  %v3649_v37 = vpack.c.bf16 %v588_v25, %v584_v23 }
  0x30   : > { %2753 = vmatprep.subr.bf16.mxu0 %v3596_v13  ;;  %2785 = vmatprep.subr.bf16.mxu1 %v3598_v14  ;;  %v338_v29 = vld [vmem:[%s291_s17] sm:$0xff]  ;;  %v339_v31 = vld [vmem:[%s291_s17 + $0x8] sm:$0xff]  ;;  %v3651_v38 = vpack.c.bf16 %v590_v27, %v586_v26  ;;  %v3668_v46 = vpack.c.bf16 %v597_v33, %v593_v30  ;;  %s2748_s17 = sshll.u32 (%p3550_p6), %s3467_s23, 3 }
  0x31   : > { %v3612_v21 = vsub.s32 %v352_v19, %v3600_v17  ;;  %v599_v35 = vld [vmem:[%s4258_s3 + $0x78] sm:$0xff]  ;;  %v592_v39 = vld [vmem:[%s4258_s3 + $0x40] sm:$0xff]  ;;  %v594_v43 = vld [vmem:[%s4258_s3 + $0x50] sm:$0xff]  ;;  %s2490_s9 = scalar_lea.vmem (%p3550_p6), %s4260_s5, %s2748_s17 }
  0x32   : > { %v596_v40 = vld [vmem:[%s4258_s3 + $0x60] sm:$0xff]  ;;  %v598_v44 = vld [vmem:[%s4258_s3 + $0x70] sm:$0xff]  ;;  %v601_v45 = vld [vmem:[%s4258_s3 + $0x88] sm:$0xff]  ;;  %v3670_v47 = vpack.c.bf16 %v599_v35, %v595_v34 }
  0x33   : > { %v356_v24 = vrot.slane %v2697_v18, %v3612_v21  ;;  %v363_v28 = vrot.slane %v349_v20, %v3612_v21  ;;  %v605_v48 = vld [vmem:[%s4258_s3 + $0xa8] sm:$0xff]  ;;  %v603_v49 = vld [vmem:[%s4258_s3 + $0x98] sm:$0xff]  ;;  %v3689_v51 = vpack.c.bf16 %v596_v40, %v592_v39  ;;  %v3691_v52 = vpack.c.bf16 %v598_v44, %v594_v43  ;;  %v600_v53 = vld [vmem:[%s4258_s3 + $0x80] sm:$0xff] }
  0x34   : > { %v607_v50 = vld [vmem:[%s4258_s3 + $0xb8] sm:$0xff]  ;;  %v604_v54 = vld [vmem:[%s4258_s3 + $0xa0] sm:$0xff]  ;;  %v3701_v55 = vpack.c.bf16 %v605_v48, %v601_v45  ;;  %v602_v57 = vld [vmem:[%s4258_s3 + $0x90] sm:$0xff] }
  0x35   : > { %v367_v32 = vrot.slane %v356_v24, %v3615_v22  ;;  %v371_v36 = vrot.slane %v363_v28, %v3615_v22  ;;  %v3703_v56 = vpack.c.bf16 %v607_v50, %v603_v49  ;;  %v606_v58 = vld [vmem:[%s4258_s3 + $0xb0] sm:$0xff]  ;;  %v609_v59 = vld [vmem:[%s4258_s3 + $0xc8] sm:$0xff]  ;;  %v611_v61 = vld [vmem:[%s4258_s3 + $0xd8] sm:$0xff]  ;;  %v3729_v63 = vpack.c.bf16 %v604_v54, %v600_v53 }
  0x36   : > { %v613_v60 = vld [vmem:[%s4258_s3 + $0xe8] sm:$0xff]  ;;  %v615_v62 = vld [vmem:[%s4258_s3 + $0xf8] sm:$0xff]  ;;  %v3731_v0 = vpack.c.bf16 %v606_v58, %v602_v57  ;;  %v608_v1 = vld [vmem:[%s4258_s3 + $0xc0] sm:$0xff] }
  0x37   : > { %v374_v41 = vmul.f32 %v367_v32, %v338_v29  ;;  %v375_v42 = vmul.f32 %v371_v36, %v339_v31  ;;  %v612_v2 = vld [vmem:[%s4258_s3 + $0xe0] sm:$0xff]  ;;  %v3741_v3 = vpack.c.bf16 %v613_v60, %v609_v59  ;;  %v3743_v4 = vpack.c.bf16 %v615_v62, %v611_v61  ;;  %v610_v5 = vld [vmem:[%s4258_s3 + $0xd0] sm:$0xff]  ;;  %v617_v7 = vld [vmem:[%s4258_s3 + $0x108] sm:$0xff] }
  0x38   : > { %v614_v6 = vld [vmem:[%s4258_s3 + $0xf0] sm:$0xff]  ;;  %v621_v8 = vld [vmem:[%s4258_s3 + $0x128] sm:$0xff]  ;;  %v619_v10 = vld [vmem:[%s4258_s3 + $0x118] sm:$0xff]  ;;  %v3767_v12 = vpack.c.bf16 %v612_v2, %v608_v1 }
  0x39   : > { %377 = vst.msk [vmem:[%s3570_s18] sm:$0xff] %vm376_vm1, %v374_v41  ;;  %2700 = vmatmul.mubr.msk.f32.vlgmr.msra.gmra.mrb[0].mxu0 %vm376_vm1, %v374_v41  ;;  %2704 = vmatmul.mubr.msk.f32.vlgmr.msra.gmra.mrb[0].mxu1 %vm376_vm1, %v374_v41  ;;  %378 = vst.msk [vmem:[%s3570_s18 + $0x8] sm:$0xff] %vm376_vm1, %v375_v42  ;;  %v623_v11 = vld [vmem:[%s4258_s3 + $0x138] sm:$0xff]  ;;  %v3769_v15 = vpack.c.bf16 %v614_v6, %v610_v5  ;;  %v616_v16 = vld [vmem:[%s4258_s3 + $0x100] sm:$0xff]  ;;  %v3779_v19 = vpack.c.bf16 %v621_v8, %v617_v7 }
  0x3a   : > { %2755 = vmatpush1.bf16.msra.mxu0 %v3649_v37  ;;  %2787 = vmatpush1.bf16.msra.mxu1 %v3651_v38  ;;  %v620_v18 = vld [vmem:[%s4258_s3 + $0x120] sm:$0xff]  ;;  %v3781_v20 = vpack.c.bf16 %v623_v11, %v619_v10  ;;  %v618_v23 = vld [vmem:[%s4258_s3 + $0x110] sm:$0xff]  ;;  %v625_v25 = vld [vmem:[%s4258_s3 + $0x148] sm:$0xff] }
  0x3b   : > { %492 = vmatprep.mubr.f32.mxu0 %v3478_v9  ;;  %569 = vmatprep.mubr.f32.mxu1 %v3478_v9  ;;  %v622_v24 = vld [vmem:[%s4258_s3 + $0x130] sm:$0xff]  ;;  %v629_v26 = vld [vmem:[%s4258_s3 + $0x168] sm:$0xff]  ;;  %v627_v27 = vld [vmem:[%s4258_s3 + $0x158] sm:$0xff]  ;;  %v3803_v29 = vpack.c.bf16 %v620_v18, %v616_v16  ;;  %v393_v18 = vsub.s32 2, %v3600_v17 }
  0x3c   : > { %2757 = vmatprep.subr.bf16.mxu0 %v3668_v46  ;;  %2789 = vmatprep.subr.bf16.mxu1 %v3670_v47  ;;  %v631_v28 = vld [vmem:[%s4258_s3 + $0x178] sm:$0xff]  ;;  %v3805_v30 = vpack.c.bf16 %v622_v24, %v618_v23  ;;  %v624_v31 = vld [vmem:[%s4258_s3 + $0x140] sm:$0xff]  ;;  %v3815_v33 = vpack.c.bf16 %v629_v26, %v625_v25  ;;  %v626_v35 = vld [vmem:[%s4258_s3 + $0x150] sm:$0xff]  ;;  %v389_v24 = vsub.s32 1, %v3600_v17  ;;  %v397_v25 = vsub.s32 3, %v3600_v17 }
  0x3d   : > { %2701 = vmatmul.mubr.msk.f32.gmra.mrb[2].mxu0 %vm376_vm1, %v375_v42  ;;  %2705 = vmatmul.mubr.msk.f32.gmra.mrb[2].mxu1 %vm376_vm1, %v375_v42  ;;  %v628_v32 = vld [vmem:[%s4258_s3 + $0x160] sm:$0xff]  ;;  %v3817_v34 = vpack.c.bf16 %v631_v28, %v627_v27  ;;  %v630_v36 = vld [vmem:[%s4258_s3 + $0x170] sm:$0xff]  ;;  %v633_v39 = vld [vmem:[%s4258_s3 + $0x188] sm:$0xff] }
  0x3e   : > { %2759 = vmatpush1.bf16.msra.mxu0 %v3689_v51  ;;  %2791 = vmatpush1.bf16.msra.mxu1 %v3691_v52  ;;  %v637_v40 = vld [vmem:[%s4258_s3 + $0x1a8] sm:$0xff]  ;;  %v635_v41 = vld [vmem:[%s4258_s3 + $0x198] sm:$0xff]  ;;  %v3839_v43 = vpack.c.bf16 %v628_v32, %v624_v31  ;;  %v3841_v44 = vpack.c.bf16 %v630_v36, %v626_v35  ;;  %v632_v45 = vld [vmem:[%s4258_s3 + $0x180] sm:$0xff] }
  0x3f   : > { %2761 = vmatprep.subr.bf16.mxu0 %v3701_v55  ;;  %2793 = vmatprep.subr.bf16.mxu1 %v3703_v56  ;;  %v639_v42 = vld [vmem:[%s4258_s3 + $0x1b8] sm:$0xff]  ;;  %v636_v48 = vld [vmem:[%s4258_s3 + $0x1a0] sm:$0xff]  ;;  %v3851_v49 = vpack.c.bf16 %v637_v40, %v633_v39  ;;  %v634_v53 = vld [vmem:[%s4258_s3 + $0x190] sm:$0xff] }
  0x40   : > { %748 = vmatprep.mubr.f32.mxu0 %v3478_v9  ;;  %819 = vmatprep.mubr.f32.mxu1 %v3478_v9  ;;  %v3853_v50 = vpack.c.bf16 %v639_v42, %v635_v41  ;;  %v638_v54 = vld [vmem:[%s4258_s3 + $0x1b0] sm:$0xff]  ;;  %v641_v57 = vld [vmem:[%s4258_s3 + $0x1c8] sm:$0xff]  ;;  %v643_v59 = vld [vmem:[%s4258_s3 + $0x1d8] sm:$0xff]  ;;  %v3875_v61 = vpack.c.bf16 %v636_v48, %v632_v45 }
  0x41   : > { %v645_v58 = vld [vmem:[%s4258_s3 + $0x1e8] sm:$0xff]  ;;  %v647_v60 = vld [vmem:[%s4258_s3 + $0x1f8] sm:$0xff]  ;;  %v3877_v62 = vpack.c.bf16 %v638_v54, %v634_v53  ;;  %v640_v1 = vld [vmem:[%s4258_s3 + $0x1c0] sm:$0xff] }
  0x42   : > { %2763 = vmatpush1.bf16.msra.mxu0 %v3729_v63  ;;  %2795 = vmatpush1.bf16.msra.mxu1 %v3731_v0  ;;  %v3884_v2 = vpack.c.bf16 %v645_v58, %v641_v57  ;;  %v3886_v5 = vpack.c.bf16 %v647_v60, %v643_v59  ;;  %v644_v6 = vld [vmem:[%s4258_s3 + $0x1e0] sm:$0xff]  ;;  %v642_v7 = vld [vmem:[%s4258_s3 + $0x1d0] sm:$0xff] }
  0x43   : > { %2765 = vmatprep.subr.bf16.mxu0 %v3741_v3  ;;  %2797 = vmatprep.subr.bf16.mxu1 %v3743_v4  ;;  %v646_v8 = vld [vmem:[%s4258_s3 + $0x1f0] sm:$0xff]  ;;  %v3899_v10 = vpack.c.bf16 %v644_v6, %v640_v1  ;;  %v648_v16 = vld [vmem:[#allocation2] sm:$0x3] }
  0x44   : > { %v3901_v11 = vpack.c.bf16 %v646_v8, %v642_v7  ;;  %v381_v23 = vld [vmem:[%s4259_s4] sm:$0xf] }
  0x45   : > { %v386_v26 = vrot.slane %v381_v23, %v3615_v22  ;;  %v394_v27 = vrot.slane %v381_v23, %v393_v18  ;;  %v390_v28 = vrot.slane %v381_v23, %v389_v24  ;;  %v398_v31 = vrot.slane %v381_v23, %v397_v25 }
  0x46   : > { %2767 = vmatpush1.bf16.msra.mxu0 %v3767_v12  ;;  %2799 = vmatpush1.bf16.msra.mxu1 %v3769_v15 }
  0x47   : > { %2769 = vmatprep.subr.bf16.mxu0 %v3779_v19  ;;  %2801 = vmatprep.subr.bf16.mxu1 %v3781_v20 }
  0x4a   : > { %2771 = vmatpush1.bf16.msra.mxu0 %v3803_v29  ;;  %2803 = vmatpush1.bf16.msra.mxu1 %v3805_v30 }
  0x4b   : > { %2773 = vmatprep.subr.bf16.mxu0 %v3815_v33  ;;  %2805 = vmatprep.subr.bf16.mxu1 %v3817_v34 }
  0x4e   : > { %2775 = vmatpush1.bf16.msra.mxu0 %v3839_v43  ;;  %2807 = vmatpush1.bf16.msra.mxu1 %v3841_v44 }
  0x4f   : > { %2777 = vmatprep.subr.bf16.mxu0 %v3851_v49  ;;  %2809 = vmatprep.subr.bf16.mxu1 %v3853_v50 }
  0x52   : > { %2779 = vmatpush1.bf16.msra.mxu0 %v3875_v61  ;;  %2811 = vmatpush1.bf16.msra.mxu1 %v3877_v62 }
  0x53   : > { %2781 = vmatprep.subr.bf16.mxu0 %v3884_v2  ;;  %2813 = vmatprep.subr.bf16.mxu1 %v3886_v5 }
  0x56   : > { %2783 = vmatpush1.bf16.msra.mxu0 %v3899_v10  ;;  %2815 = vmatpush1.bf16.msra.mxu1 %v3901_v11 }
  0x57   : > { %2817 = vmatprep.subr.bf16.mxu0 %v3596_v13  ;;  %2849 = vmatprep.subr.bf16.mxu1 %v3598_v14 }
  0x59   : > { %749 = vmatmul.mubr.f32.vlgmr.msra.gmra.mrb[4].mxu0 %v648_v16  ;;  %820 = vmatmul.mubr.f32.vlgmr.msra.gmra.mrb[4].mxu1 %v648_v16 }
  0x5a   : > { %2819 = vmatpush1.bf16.msra.mxu0 %v3649_v37  ;;  %2851 = vmatpush1.bf16.msra.mxu1 %v3651_v38 }
  0x5b   : > { %2821 = vmatprep.subr.bf16.mxu0 %v3668_v46  ;;  %2853 = vmatprep.subr.bf16.mxu1 %v3670_v47 }
  0x5c   : > { %976 = vmatprep.mubr.f32.mxu0 %v3478_v9  ;;  %1047 = vmatprep.mubr.f32.mxu1 %v3478_v9 }
  0x5e   : > { %2823 = vmatpush1.bf16.msra.mxu0 %v3689_v51  ;;  %2855 = vmatpush1.bf16.msra.mxu1 %v3691_v52 }
  0x5f   : > { %2825 = vmatprep.subr.bf16.mxu0 %v3701_v55  ;;  %2857 = vmatprep.subr.bf16.mxu1 %v3703_v56 }
  0x62   : > { %2827 = vmatpush1.bf16.msra.mxu0 %v3729_v63  ;;  %2859 = vmatpush1.bf16.msra.mxu1 %v3731_v0 }
  0x63   : > { %2829 = vmatprep.subr.bf16.mxu0 %v3741_v3  ;;  %2861 = vmatprep.subr.bf16.mxu1 %v3743_v4 }
  0x66   : > { %2831 = vmatpush1.bf16.msra.mxu0 %v3767_v12  ;;  %2863 = vmatpush1.bf16.msra.mxu1 %v3769_v15 }
  0x67   : > { %2833 = vmatprep.subr.bf16.mxu0 %v3779_v19  ;;  %2865 = vmatprep.subr.bf16.mxu1 %v3781_v20 }
  0x6a   : > { %2835 = vmatpush1.bf16.msra.mxu0 %v3803_v29  ;;  %2867 = vmatpush1.bf16.msra.mxu1 %v3805_v30 }
  0x6b   : > { %2837 = vmatprep.subr.bf16.mxu0 %v3815_v33  ;;  %2869 = vmatprep.subr.bf16.mxu1 %v3817_v34 }
  0x6e   : > { %2839 = vmatpush1.bf16.msra.mxu0 %v3839_v43  ;;  %2871 = vmatpush1.bf16.msra.mxu1 %v3841_v44 }
  0x6f   : > { %2841 = vmatprep.subr.bf16.mxu0 %v3851_v49  ;;  %2873 = vmatprep.subr.bf16.mxu1 %v3853_v50 }
  0x72   : > { %2843 = vmatpush1.bf16.msra.mxu0 %v3875_v61  ;;  %2875 = vmatpush1.bf16.msra.mxu1 %v3877_v62 }
  0x73   : > { %2845 = vmatprep.subr.bf16.mxu0 %v3884_v2  ;;  %2877 = vmatprep.subr.bf16.mxu1 %v3886_v5 }
  0x76   : > { %2847 = vmatpush1.bf16.msra.mxu0 %v3899_v10  ;;  %2879 = vmatpush1.bf16.msra.mxu1 %v3901_v11 }
  0x77   : > { %2881 = vmatprep.subr.bf16.mxu0 %v3596_v13  ;;  %2913 = vmatprep.subr.bf16.mxu1 %v3598_v14 }
 0x10c   : > { %v488_v32 = vpop.f32.mrb[0].mxu0  ;;  %v565_v35 = vpop.f32.mrb[0].mxu1 }
 0x10d   : > { %v489_v36 = vadd.f32 %v488_v32, %v386_v26  ;;  %v566_v39 = vadd.f32 %v565_v35, %v394_v27  ;;  %v490_v40 = vpop.f32.mrb[1].mxu0  ;;  %v567_v41 = vpop.f32.mrb[1].mxu1 }
 0x10e   : > { %v491_v42 = vadd.f32 %v490_v40, %v390_v28  ;;  %v568_v45 = vadd.f32 %v567_v41, %v398_v31 }
 0x10f   : > { %576 = vst [vmem:[#allocation4] sm:$0xff] %v489_v36  ;;  %578 = vst [vmem:[#allocation4 + $0x10] sm:$0xff] %v566_v39 }
 0x110   : > { %577 = vst [vmem:[#allocation4 + $0x8] sm:$0xff] %v491_v42  ;;  %579 = vst [vmem:[#allocation4 + $0x18] sm:$0xff] %v568_v45  ;;  %v494_v48 = vpop.f32.mrb[2].mxu0  ;;  %v571_v53 = vpop.f32.mrb[2].mxu1 }
 0x111   : > { %v495_v17 = vadd.f32 %v494_v48, %v386_v26  ;;  %v572_v54 = vadd.f32 %v571_v53, %v394_v27  ;;  %v496_v22 = vpop.f32.mrb[3].mxu0  ;;  %v573_v57 = vpop.f32.mrb[3].mxu1 }
 0x112   : > { %v497_v58 = vadd.f32 %v496_v22, %v390_v28  ;;  %v574_v59 = vadd.f32 %v573_v57, %v398_v31  ;;  %v649_v22 = vld [vmem:[#allocation3] sm:$0x3] }
 0x113   : > { %580 = vst [vmem:[#allocation4 + $0x20] sm:$0xff] %v495_v17  ;;  %582 = vst [vmem:[#allocation4 + $0x30] sm:$0xff] %v572_v54 }
 0x114   : > { %581 = vst [vmem:[#allocation4 + $0x28] sm:$0xff] %v497_v58  ;;  %583 = vst [vmem:[#allocation4 + $0x38] sm:$0xff] %v574_v59 }
 0x117   : > { %v650_v1 = vld [vmem:[#allocation4] ss:$8 sm:$0xf] }
 0x11b   : > { %v652_v60 = vld [vmem:[#allocation4 + $0x20] ss:$8 sm:$0xf] }
 0x11c   : > { %v655_v6 = vcombine.low %v650_v1, %v652_v60 }
 0x11e   : > { %v662_v7 = vrot.slane %v655_v6, %v3612_v21 }
 0x120   : > { %v663_v8 = vcombine.high %v662_v7, %v662_v7  ;;  %v670_v16 = vrot.slane %v662_v7, %v3612_v21 }
 0x122   : > { %v677_v24 = vrot.slane %v663_v8, %v3612_v21  ;;  %v678_v39 = vcombine.high %v670_v16, %v670_v16 }
 0x124   : > { %v679_v35 = vcombine.high %v677_v24, %v677_v24 }
 0x12c   : > { %v750_v18 = vpop.f32.mrb[4].mxu0  ;;  %v821_v23 = vpop.f32.mrb[4].mxu1 }
 0x12d   : > { %v751_v25 = vadd.f32 %v750_v18, %v670_v16  ;;  %v752_v26 = vpop.f32.mrb[5].mxu0  ;;  %v823_v27 = vpop.f32.mrb[5].mxu1  ;;  %v822_v41 = vadd.f32 %v821_v23, %v678_v39 }
 0x12e   : > { %v753_v28 = vadd.f32 %v752_v26, %v677_v24  ;;  %v824_v36 = vadd.f32 %v823_v27, %v679_v35  ;;  %v880_v24 = vld [vmem:[#allocation4 + $0x21] ss:$8 sm:$0xf] }
 0x12f   : > { %v2706_v31 = vmul.f32 -1.442695, %v751_v25  ;;  %v878_v25 = vld [vmem:[#allocation4 + $0x1] ss:$8 sm:$0xf] }
 0x130   : > { %v2707_v32 = vmul.f32 -1.442695, %v753_v28  ;;  %v2708_v40 = vmul.f32 -1.442695, %v824_v36  ;;  %v883_v26 = vcombine.low %v878_v25, %v880_v24 }
 0x131   : > { %3309 = vpow2.f32 %v2706_v31 }
 0x132   : > { %3311 = vpow2.f32 %v2707_v32  ;;  %v890_v27 = vrot.slane %v883_v26, %v3612_v21 }
 0x133   : > { %3313 = vpow2.f32 %v2708_v40 }
 0x134   : > { %3315 = vtanh.f32 %v822_v41  ;;  %v891_v28 = vcombine.high %v890_v27, %v890_v27  ;;  %v898_v31 = vrot.slane %v890_v27, %v3612_v21 }
 0x136   : > { %v905_v36 = vrot.slane %v891_v28, %v3612_v21 }
 0x13b   : > { %v3310_v42 = vpop.eup %3309 }
 0x13c   : > { %v3312_v45 = vpop.eup %3311  ;;  %v829_v48 = vadd.f32 1.0, %v3310_v42 }
 0x13d   : > { %v835_v53 = vadd.f32 1.0, %v3312_v45  ;;  %v3314_v17 = vpop.eup %3313 }
 0x13e   : > { %3317 = vrcp.f32 %v829_v48  ;;  %v3316_v54 = vpop.eup %3315  ;;  %v842_v60 = vadd.f32 1.0, %v3314_v17 }
 0x13f   : > { %3319 = vrcp.f32 %v835_v53  ;;  %v907_v53 = vcombine.high %v905_v36, %v905_v36 }
 0x140   : > { %3321 = vrcp.f32 %v842_v60 }
 0x148   : > { %v3318_v57 = vpop.eup %3317 }
 0x149   : > { %v3320_v58 = vpop.eup %3319  ;;  %v846_v59 = vmul.f32 %v3318_v57, %v3316_v54  ;;  %v906_v54 = vcombine.high %v898_v31, %v898_v31 }
 0x14a   : > { %v845_v1 = vmul.f32 %v3320_v58, %v649_v22  ;;  %v3322_v7 = vpop.eup %3321 }
 0x14c   : > { %v3953_v6 = vadd.f32 %v846_v59, %v845_v1 }
 0x14e   : > { %3323 = vtanh.f32 %v3953_v6 }
 0x158   : > { %v3324_v8 = vpop.eup %3323 }
 0x159   : > { %v849_v16 = vmul.f32 %v3324_v8, %v3322_v7 }
 0x15b   : > { %v857_v18 = vrot.slane %v849_v16, %v3612_v21  ;;  %977 = vmatmul.mubr.f32.vlgmr.msra.gmra.mrb[6].mxu0 %v849_v16  ;;  %1048 = vmatmul.mubr.f32.vlgmr.msra.gmra.mrb[6].mxu1 %v849_v16 }
 0x15c   : > { %2883 = vmatpush1.bf16.msra.mxu0 %v3649_v37  ;;  %2915 = vmatpush1.bf16.msra.mxu1 %v3651_v38 }
 0x15d   : > { %v858_v23 = vcombine.high %v857_v18, %v857_v18  ;;  %2709 = vst.sshfl [vmem:[%s3573_s19] sm:$0x1 pattern:$0x73625140] %v857_v18  ;;  %2885 = vmatprep.subr.bf16.mxu0 %v3668_v46  ;;  %2917 = vmatprep.subr.bf16.mxu1 %v3670_v47 }
 0x15e   : > { %1204 = vmatprep.mubr.f32.mxu0 %v3478_v9  ;;  %1275 = vmatprep.mubr.f32.mxu1 %v3478_v9 }
 0x15f   : > { %2710 = vst.sshfl [vmem:[%s3573_s19 + $0x8] sm:$0x1 pattern:$0x73625140] %v858_v23 }
 0x160   : > { %2887 = vmatpush1.bf16.msra.mxu0 %v3689_v51  ;;  %2919 = vmatpush1.bf16.msra.mxu1 %v3691_v52 }
 0x161   : > { %2889 = vmatprep.subr.bf16.mxu0 %v3701_v55  ;;  %2921 = vmatprep.subr.bf16.mxu1 %v3703_v56 }
 0x164   : > { %2891 = vmatpush1.bf16.msra.mxu0 %v3729_v63  ;;  %2923 = vmatpush1.bf16.msra.mxu1 %v3731_v0 }
 0x165   : > { %2893 = vmatprep.subr.bf16.mxu0 %v3741_v3  ;;  %2925 = vmatprep.subr.bf16.mxu1 %v3743_v4 }
 0x168   : > { %2895 = vmatpush1.bf16.msra.mxu0 %v3767_v12  ;;  %2927 = vmatpush1.bf16.msra.mxu1 %v3769_v15 }
 0x169   : > { %2897 = vmatprep.subr.bf16.mxu0 %v3779_v19  ;;  %2929 = vmatprep.subr.bf16.mxu1 %v3781_v20 }
 0x16c   : > { %2899 = vmatpush1.bf16.msra.mxu0 %v3803_v29  ;;  %2931 = vmatpush1.bf16.msra.mxu1 %v3805_v30 }
 0x16d   : > { %2901 = vmatprep.subr.bf16.mxu0 %v3815_v33  ;;  %2933 = vmatprep.subr.bf16.mxu1 %v3817_v34 }
 0x170   : > { %2903 = vmatpush1.bf16.msra.mxu0 %v3839_v43  ;;  %2935 = vmatpush1.bf16.msra.mxu1 %v3841_v44 }
 0x171   : > { %2905 = vmatprep.subr.bf16.mxu0 %v3851_v49  ;;  %2937 = vmatprep.subr.bf16.mxu1 %v3853_v50 }
 0x174   : > { %2907 = vmatpush1.bf16.msra.mxu0 %v3875_v61  ;;  %2939 = vmatpush1.bf16.msra.mxu1 %v3877_v62 }
 0x175   : > { %2909 = vmatprep.subr.bf16.mxu0 %v3884_v2  ;;  %2941 = vmatprep.subr.bf16.mxu1 %v3886_v5 }
 0x178   : > { %2911 = vmatpush1.bf16.msra.mxu0 %v3899_v10  ;;  %2943 = vmatpush1.bf16.msra.mxu1 %v3901_v11 }
 0x179   : > { %2945 = vmatprep.subr.bf16.mxu0 %v3596_v13  ;;  %2977 = vmatprep.subr.bf16.mxu1 %v3598_v14 }
 0x22e   : > { %v978_v32 = vpop.f32.mrb[6].mxu0  ;;  %v1049_v35 = vpop.f32.mrb[6].mxu1 }
 0x22f   : > { %v979_v39 = vadd.f32 %v978_v32, %v898_v31  ;;  %v980_v40 = vpop.f32.mrb[7].mxu0  ;;  %v1051_v41 = vpop.f32.mrb[7].mxu1  ;;  %v1050_v57 = vadd.f32 %v1049_v35, %v906_v54 }
 0x230   : > { %v981_v42 = vadd.f32 %v980_v40, %v905_v36  ;;  %v1052_v17 = vadd.f32 %v1051_v41, %v907_v53  ;;  %v1106_v36 = vld [vmem:[#allocation4 + $0x2] ss:$8 sm:$0xf] }
 0x231   : > { %v2711_v45 = vmul.f32 -1.442695, %v979_v39 }
 0x232   : > { %v2712_v48 = vmul.f32 -1.442695, %v981_v42  ;;  %v2713_v22 = vmul.f32 -1.442695, %v1052_v17 }
 0x233   : > { %3325 = vpow2.f32 %v2711_v45 }
 0x234   : > { %3327 = vpow2.f32 %v2712_v48 }
 0x235   : > { %3329 = vpow2.f32 %v2713_v22 }
 0x236   : > { %3331 = vtanh.f32 %v1050_v57 }
 0x23d   : > { %v3326_v58 = vpop.eup %3325 }
 0x23e   : > { %v3328_v59 = vpop.eup %3327  ;;  %v1057_v60 = vadd.f32 1.0, %v3326_v58 }
 0x23f   : > { %v1063_v1 = vadd.f32 1.0, %v3328_v59  ;;  %v3330_v7 = vpop.eup %3329 }
 0x240   : > { %3333 = vrcp.f32 %v1057_v60  ;;  %v3332_v8 = vpop.eup %3331  ;;  %v1070_v24 = vadd.f32 1.0, %v3330_v7 }
 0x241   : > { %3335 = vrcp.f32 %v1063_v1 }
 0x242   : > { %3337 = vrcp.f32 %v1070_v24 }
 0x24a   : > { %v3334_v16 = vpop.eup %3333 }
 0x24b   : > { %v3336_v18 = vpop.eup %3335  ;;  %v1074_v23 = vmul.f32 %v3334_v16, %v3332_v8 }
 0x24c   : > { %v1073_v25 = vmul.f32 %v3336_v18, %v3953_v6  ;;  %v3338_v27 = vpop.eup %3337  ;;  %v1108_v6 = vld [vmem:[#allocation4 + $0x22] ss:$8 sm:$0xf] }
 0x24d   : > { %v1111_v39 = vcombine.low %v1106_v36, %v1108_v6 }
 0x24e   : > { %v3997_v26 = vadd.f32 %v1074_v23, %v1073_v25 }
 0x24f   : > { %v1118_v40 = vrot.slane %v1111_v39, %v3612_v21 }
 0x250   : > { %3339 = vtanh.f32 %v3997_v26 }
 0x251   : > { %v1119_v41 = vcombine.high %v1118_v40, %v1118_v40  ;;  %v1126_v42 = vrot.slane %v1118_v40, %v3612_v21 }
 0x253   : > { %v1133_v53 = vrot.slane %v1119_v41, %v3612_v21  ;;  %v1134_v7 = vcombine.high %v1126_v42, %v1126_v42 }
 0x255   : > { %v1135_v60 = vcombine.high %v1133_v53, %v1133_v53 }
 0x25a   : > { %v3340_v28 = vpop.eup %3339 }
 0x25b   : > { %v1077_v31 = vmul.f32 %v3340_v28, %v3338_v27 }
 0x25d   : > { %v1085_v32 = vrot.slane %v1077_v31, %v3612_v21  ;;  %1205 = vmatmul.mubr.f32.vlgmr.msra.gmra.mrb[8].mxu0 %v1077_v31  ;;  %1276 = vmatmul.mubr.f32.vlgmr.msra.gmra.mrb[8].mxu1 %v1077_v31 }
 0x25e   : > { %2947 = vmatpush1.bf16.msra.mxu0 %v3649_v37  ;;  %2979 = vmatpush1.bf16.msra.mxu1 %v3651_v38 }
 0x25f   : > { %v1086_v35 = vcombine.high %v1085_v32, %v1085_v32  ;;  %2714 = vst.sshfl [vmem:[%s3573_s19 + $0x1] sm:$0x1 pattern:$0x73625140] %v1085_v32  ;;  %2949 = vmatprep.subr.bf16.mxu0 %v3668_v46  ;;  %2981 = vmatprep.subr.bf16.mxu1 %v3670_v47 }
 0x260   : > { %1432 = vmatprep.mubr.f32.mxu0 %v3478_v9  ;;  %1503 = vmatprep.mubr.f32.mxu1 %v3478_v9 }
 0x261   : > { %2715 = vst.sshfl [vmem:[%s3573_s19 + $0x9] sm:$0x1 pattern:$0x73625140] %v1086_v35 }
 0x262   : > { %2951 = vmatpush1.bf16.msra.mxu0 %v3689_v51  ;;  %2983 = vmatpush1.bf16.msra.mxu1 %v3691_v52 }
 0x263   : > { %2953 = vmatprep.subr.bf16.mxu0 %v3701_v55  ;;  %2985 = vmatprep.subr.bf16.mxu1 %v3703_v56 }
 0x266   : > { %2955 = vmatpush1.bf16.msra.mxu0 %v3729_v63  ;;  %2987 = vmatpush1.bf16.msra.mxu1 %v3731_v0 }
 0x267   : > { %2957 = vmatprep.subr.bf16.mxu0 %v3741_v3  ;;  %2989 = vmatprep.subr.bf16.mxu1 %v3743_v4 }
 0x26a   : > { %2959 = vmatpush1.bf16.msra.mxu0 %v3767_v12  ;;  %2991 = vmatpush1.bf16.msra.mxu1 %v3769_v15 }
 0x26b   : > { %2961 = vmatprep.subr.bf16.mxu0 %v3779_v19  ;;  %2993 = vmatprep.subr.bf16.mxu1 %v3781_v20 }
 0x26e   : > { %2963 = vmatpush1.bf16.msra.mxu0 %v3803_v29  ;;  %2995 = vmatpush1.bf16.msra.mxu1 %v3805_v30 }
 0x26f   : > { %2965 = vmatprep.subr.bf16.mxu0 %v3815_v33  ;;  %2997 = vmatprep.subr.bf16.mxu1 %v3817_v34 }
 0x272   : > { %2967 = vmatpush1.bf16.msra.mxu0 %v3839_v43  ;;  %2999 = vmatpush1.bf16.msra.mxu1 %v3841_v44 }
 0x273   : > { %2969 = vmatprep.subr.bf16.mxu0 %v3851_v49  ;;  %3001 = vmatprep.subr.bf16.mxu1 %v3853_v50 }
 0x276   : > { %2971 = vmatpush1.bf16.msra.mxu0 %v3875_v61  ;;  %3003 = vmatpush1.bf16.msra.mxu1 %v3877_v62 }
 0x277   : > { %2973 = vmatprep.subr.bf16.mxu0 %v3884_v2  ;;  %3005 = vmatprep.subr.bf16.mxu1 %v3886_v5 }
 0x27a   : > { %2975 = vmatpush1.bf16.msra.mxu0 %v3899_v10  ;;  %3007 = vmatpush1.bf16.msra.mxu1 %v3901_v11 }
 0x27b   : > { %3009 = vmatprep.subr.bf16.mxu0 %v3596_v13  ;;  %3041 = vmatprep.subr.bf16.mxu1 %v3598_v14 }
 0x330   : > { %v1206_v45 = vpop.f32.mrb[8].mxu0  ;;  %v1277_v48 = vpop.f32.mrb[8].mxu1 }
 0x331   : > { %v1207_v17 = vadd.f32 %v1206_v45, %v1126_v42  ;;  %v1208_v54 = vpop.f32.mrb[9].mxu0  ;;  %v1279_v22 = vpop.f32.mrb[9].mxu1  ;;  %v1278_v16 = vadd.f32 %v1277_v48, %v1134_v7 }
 0x332   : > { %v1209_v57 = vadd.f32 %v1208_v54, %v1133_v53  ;;  %v1280_v1 = vadd.f32 %v1279_v22, %v1135_v60  ;;  %v1334_v53 = vld [vmem:[#allocation4 + $0x3] ss:$8 sm:$0xf] }
 0x333   : > { %v2716_v58 = vmul.f32 -1.442695, %v1207_v17 }
 0x334   : > { %v2717_v59 = vmul.f32 -1.442695, %v1209_v57  ;;  %v2718_v8 = vmul.f32 -1.442695, %v1280_v1 }
 0x335   : > { %3341 = vpow2.f32 %v2716_v58 }
 0x336   : > { %3343 = vpow2.f32 %v2717_v59 }
 0x337   : > { %3345 = vpow2.f32 %v2718_v8 }
 0x338   : > { %3347 = vtanh.f32 %v1278_v16 }
 0x33f   : > { %v3342_v18 = vpop.eup %3341 }
 0x340   : > { %v3344_v23 = vpop.eup %3343  ;;  %v1285_v24 = vadd.f32 1.0, %v3342_v18 }
 0x341   : > { %v1291_v25 = vadd.f32 1.0, %v3344_v23  ;;  %v3346_v27 = vpop.eup %3345 }
 0x342   : > { %3349 = vrcp.f32 %v1285_v24  ;;  %v3348_v28 = vpop.eup %3347  ;;  %v1298_v6 = vadd.f32 1.0, %v3346_v27 }
 0x343   : > { %3351 = vrcp.f32 %v1291_v25 }
 0x344   : > { %3353 = vrcp.f32 %v1298_v6 }
 0x34c   : > { %v3350_v31 = vpop.eup %3349 }
 0x34d   : > { %v3352_v32 = vpop.eup %3351  ;;  %v1302_v35 = vmul.f32 %v3350_v31, %v3348_v28 }
 0x34e   : > { %v1301_v36 = vmul.f32 %v3352_v32, %v3997_v26  ;;  %v3354_v40 = vpop.eup %3353  ;;  %v1336_v26 = vld [vmem:[#allocation4 + $0x23] ss:$8 sm:$0xf] }
 0x34f   : > { %v1339_v17 = vcombine.low %v1334_v53, %v1336_v26 }
 0x350   : > { %v4041_v39 = vadd.f32 %v1302_v35, %v1301_v36 }
 0x351   : > { %v1346_v54 = vrot.slane %v1339_v17, %v3612_v21 }
 0x352   : > { %3355 = vtanh.f32 %v4041_v39 }
 0x353   : > { %v1347_v22 = vcombine.high %v1346_v54, %v1346_v54  ;;  %v1354_v57 = vrot.slane %v1346_v54, %v3612_v21 }
 0x355   : > { %v1361_v60 = vrot.slane %v1347_v22, %v3612_v21  ;;  %v1362_v27 = vcombine.high %v1354_v57, %v1354_v57 }
 0x357   : > { %v1363_v24 = vcombine.high %v1361_v60, %v1361_v60 }
 0x35c   : > { %v3356_v41 = vpop.eup %3355 }
 0x35d   : > { %v1305_v42 = vmul.f32 %v3356_v41, %v3354_v40 }
 0x35f   : > { %v1313_v45 = vrot.slane %v1305_v42, %v3612_v21  ;;  %1433 = vmatmul.mubr.f32.vlgmr.msra.gmra.mrb[10].mxu0 %v1305_v42  ;;  %1504 = vmatmul.mubr.f32.vlgmr.msra.gmra.mrb[10].mxu1 %v1305_v42 }
 0x360   : > { %3011 = vmatpush1.bf16.msra.mxu0 %v3649_v37  ;;  %3043 = vmatpush1.bf16.msra.mxu1 %v3651_v38 }
 0x361   : > { %v1314_v48 = vcombine.high %v1313_v45, %v1313_v45  ;;  %2719 = vst.sshfl [vmem:[%s3573_s19 + $0x2] sm:$0x1 pattern:$0x73625140] %v1313_v45  ;;  %3013 = vmatprep.subr.bf16.mxu0 %v3668_v46  ;;  %3045 = vmatprep.subr.bf16.mxu1 %v3670_v47 }
 0x362   : > { %1660 = vmatprep.mubr.f32.mxu0 %v3478_v9  ;;  %1731 = vmatprep.mubr.f32.mxu1 %v3478_v9 }
 0x363   : > { %2720 = vst.sshfl [vmem:[%s3573_s19 + $0xa] sm:$0x1 pattern:$0x73625140] %v1314_v48 }
 0x364   : > { %3015 = vmatpush1.bf16.msra.mxu0 %v3689_v51  ;;  %3047 = vmatpush1.bf16.msra.mxu1 %v3691_v52 }
 0x365   : > { %3017 = vmatprep.subr.bf16.mxu0 %v3701_v55  ;;  %3049 = vmatprep.subr.bf16.mxu1 %v3703_v56 }
 0x368   : > { %3019 = vmatpush1.bf16.msra.mxu0 %v3729_v63  ;;  %3051 = vmatpush1.bf16.msra.mxu1 %v3731_v0 }
 0x369   : > { %3021 = vmatprep.subr.bf16.mxu0 %v3741_v3  ;;  %3053 = vmatprep.subr.bf16.mxu1 %v3743_v4 }
 0x36c   : > { %3023 = vmatpush1.bf16.msra.mxu0 %v3767_v12  ;;  %3055 = vmatpush1.bf16.msra.mxu1 %v3769_v15 }
 0x36d   : > { %3025 = vmatprep.subr.bf16.mxu0 %v3779_v19  ;;  %3057 = vmatprep.subr.bf16.mxu1 %v3781_v20 }
 0x370   : > { %3027 = vmatpush1.bf16.msra.mxu0 %v3803_v29  ;;  %3059 = vmatpush1.bf16.msra.mxu1 %v3805_v30 }
 0x371   : > { %3029 = vmatprep.subr.bf16.mxu0 %v3815_v33  ;;  %3061 = vmatprep.subr.bf16.mxu1 %v3817_v34 }
 0x374   : > { %3031 = vmatpush1.bf16.msra.mxu0 %v3839_v43  ;;  %3063 = vmatpush1.bf16.msra.mxu1 %v3841_v44 }
 0x375   : > { %3033 = vmatprep.subr.bf16.mxu0 %v3851_v49  ;;  %3065 = vmatprep.subr.bf16.mxu1 %v3853_v50 }
 0x378   : > { %3035 = vmatpush1.bf16.msra.mxu0 %v3875_v61  ;;  %3067 = vmatpush1.bf16.msra.mxu1 %v3877_v62 }
 0x379   : > { %3037 = vmatprep.subr.bf16.mxu0 %v3884_v2  ;;  %3069 = vmatprep.subr.bf16.mxu1 %v3886_v5 }
 0x37c   : > { %3039 = vmatpush1.bf16.msra.mxu0 %v3899_v10  ;;  %3071 = vmatpush1.bf16.msra.mxu1 %v3901_v11 }
 0x37d   : > { %3073 = vmatprep.subr.bf16.mxu0 %v3596_v13  ;;  %3105 = vmatprep.subr.bf16.mxu1 %v3598_v14 }
 0x432   : > { %v1434_v58 = vpop.f32.mrb[10].mxu0  ;;  %v1505_v59 = vpop.f32.mrb[10].mxu1 }
 0x433   : > { %v1435_v1 = vadd.f32 %v1434_v58, %v1354_v57  ;;  %v1436_v7 = vpop.f32.mrb[11].mxu0  ;;  %v1507_v8 = vpop.f32.mrb[11].mxu1  ;;  %v1506_v31 = vadd.f32 %v1505_v59, %v1362_v27 }
 0x434   : > { %v1437_v16 = vadd.f32 %v1436_v7, %v1361_v60  ;;  %v1508_v25 = vadd.f32 %v1507_v8, %v1363_v24  ;;  %v1562_v60 = vld [vmem:[#allocation4 + $0x4] ss:$8 sm:$0xf] }
 0x435   : > { %v2721_v18 = vmul.f32 -1.442695, %v1435_v1 }
 0x436   : > { %v2722_v23 = vmul.f32 -1.442695, %v1437_v16  ;;  %v2723_v28 = vmul.f32 -1.442695, %v1508_v25 }
 0x437   : > { %3357 = vpow2.f32 %v2721_v18 }
 0x438   : > { %3359 = vpow2.f32 %v2722_v23 }
 0x439   : > { %3361 = vpow2.f32 %v2723_v28 }
 0x43a   : > { %3363 = vtanh.f32 %v1506_v31 }
 0x441   : > { %v3358_v32 = vpop.eup %3357 }
 0x442   : > { %v3360_v35 = vpop.eup %3359  ;;  %v1513_v6 = vadd.f32 1.0, %v3358_v32 }
 0x443   : > { %v1519_v36 = vadd.f32 1.0, %v3360_v35  ;;  %v3362_v40 = vpop.eup %3361 }
 0x444   : > { %3365 = vrcp.f32 %v1513_v6  ;;  %v3364_v41 = vpop.eup %3363  ;;  %v1526_v26 = vadd.f32 1.0, %v3362_v40 }
 0x445   : > { %3367 = vrcp.f32 %v1519_v36 }
 0x446   : > { %3369 = vrcp.f32 %v1526_v26 }
 0x44e   : > { %v3366_v42 = vpop.eup %3365 }
 0x44f   : > { %v3368_v45 = vpop.eup %3367  ;;  %v1530_v48 = vmul.f32 %v3366_v42, %v3364_v41 }
 0x450   : > { %v1529_v53 = vmul.f32 %v3368_v45, %v4041_v39  ;;  %v3370_v54 = vpop.eup %3369  ;;  %v1564_v39 = vld [vmem:[#allocation4 + $0x24] ss:$8 sm:$0xf] }
 0x451   : > { %v1567_v1 = vcombine.low %v1562_v60, %v1564_v39 }
 0x452   : > { %v4085_v17 = vadd.f32 %v1530_v48, %v1529_v53 }
 0x453   : > { %v1574_v7 = vrot.slane %v1567_v1, %v3612_v21 }
 0x454   : > { %3371 = vtanh.f32 %v4085_v17 }
 0x455   : > { %v1575_v8 = vcombine.high %v1574_v7, %v1574_v7  ;;  %v1582_v16 = vrot.slane %v1574_v7, %v3612_v21 }
 0x457   : > { %v1589_v24 = vrot.slane %v1575_v8, %v3612_v21  ;;  %v1590_v40 = vcombine.high %v1582_v16, %v1582_v16 }
 0x459   : > { %v1591_v6 = vcombine.high %v1589_v24, %v1589_v24 }
 0x45e   : > { %v3372_v22 = vpop.eup %3371 }
 0x45f   : > { %v1533_v57 = vmul.f32 %v3372_v22, %v3370_v54 }
 0x461   : > { %v1541_v58 = vrot.slane %v1533_v57, %v3612_v21  ;;  %1661 = vmatmul.mubr.f32.vlgmr.msra.gmra.mrb[12].mxu0 %v1533_v57  ;;  %1732 = vmatmul.mubr.f32.vlgmr.msra.gmra.mrb[12].mxu1 %v1533_v57 }
 0x462   : > { %3075 = vmatpush1.bf16.msra.mxu0 %v3649_v37  ;;  %3107 = vmatpush1.bf16.msra.mxu1 %v3651_v38 }
 0x463   : > { %v1542_v59 = vcombine.high %v1541_v58, %v1541_v58  ;;  %2724 = vst.sshfl [vmem:[%s3573_s19 + $0x3] sm:$0x1 pattern:$0x73625140] %v1541_v58  ;;  %3077 = vmatprep.subr.bf16.mxu0 %v3668_v46  ;;  %3109 = vmatprep.subr.bf16.mxu1 %v3670_v47 }
 0x464   : > { %1888 = vmatprep.mubr.f32.mxu0 %v3478_v9  ;;  %1959 = vmatprep.mubr.f32.mxu1 %v3478_v9 }
 0x465   : > { %2725 = vst.sshfl [vmem:[%s3573_s19 + $0xb] sm:$0x1 pattern:$0x73625140] %v1542_v59 }
 0x466   : > { %3079 = vmatpush1.bf16.msra.mxu0 %v3689_v51  ;;  %3111 = vmatpush1.bf16.msra.mxu1 %v3691_v52 }
 0x467   : > { %3081 = vmatprep.subr.bf16.mxu0 %v3701_v55  ;;  %3113 = vmatprep.subr.bf16.mxu1 %v3703_v56 }
 0x46a   : > { %3083 = vmatpush1.bf16.msra.mxu0 %v3729_v63  ;;  %3115 = vmatpush1.bf16.msra.mxu1 %v3731_v0 }
 0x46b   : > { %3085 = vmatprep.subr.bf16.mxu0 %v3741_v3  ;;  %3117 = vmatprep.subr.bf16.mxu1 %v3743_v4 }
 0x46e   : > { %3087 = vmatpush1.bf16.msra.mxu0 %v3767_v12  ;;  %3119 = vmatpush1.bf16.msra.mxu1 %v3769_v15 }
 0x46f   : > { %3089 = vmatprep.subr.bf16.mxu0 %v3779_v19  ;;  %3121 = vmatprep.subr.bf16.mxu1 %v3781_v20 }
 0x472   : > { %3091 = vmatpush1.bf16.msra.mxu0 %v3803_v29  ;;  %3123 = vmatpush1.bf16.msra.mxu1 %v3805_v30 }
 0x473   : > { %3093 = vmatprep.subr.bf16.mxu0 %v3815_v33  ;;  %3125 = vmatprep.subr.bf16.mxu1 %v3817_v34 }
 0x476   : > { %3095 = vmatpush1.bf16.msra.mxu0 %v3839_v43  ;;  %3127 = vmatpush1.bf16.msra.mxu1 %v3841_v44 }
 0x477   : > { %3097 = vmatprep.subr.bf16.mxu0 %v3851_v49  ;;  %3129 = vmatprep.subr.bf16.mxu1 %v3853_v50 }
 0x47a   : > { %3099 = vmatpush1.bf16.msra.mxu0 %v3875_v61  ;;  %3131 = vmatpush1.bf16.msra.mxu1 %v3877_v62 }
 0x47b   : > { %3101 = vmatprep.subr.bf16.mxu0 %v3884_v2  ;;  %3133 = vmatprep.subr.bf16.mxu1 %v3886_v5 }
 0x47e   : > { %3103 = vmatpush1.bf16.msra.mxu0 %v3899_v10  ;;  %3135 = vmatpush1.bf16.msra.mxu1 %v3901_v11 }
 0x47f   : > { %3137 = vmatprep.subr.bf16.mxu0 %v3596_v13  ;;  %3169 = vmatprep.subr.bf16.mxu1 %v3598_v14 }
 0x534   : > { %v1662_v18 = vpop.f32.mrb[12].mxu0  ;;  %v1733_v23 = vpop.f32.mrb[12].mxu1 }
 0x535   : > { %v1663_v25 = vadd.f32 %v1662_v18, %v1582_v16  ;;  %v1664_v27 = vpop.f32.mrb[13].mxu0  ;;  %v1735_v28 = vpop.f32.mrb[13].mxu1  ;;  %v1734_v42 = vadd.f32 %v1733_v23, %v1590_v40 }
 0x536   : > { %v1665_v31 = vadd.f32 %v1664_v27, %v1589_v24  ;;  %v1736_v36 = vadd.f32 %v1735_v28, %v1591_v6  ;;  %v1790_v24 = vld [vmem:[#allocation4 + $0x5] ss:$8 sm:$0xf] }
 0x537   : > { %v2726_v32 = vmul.f32 -1.442695, %v1663_v25 }
 0x538   : > { %v2727_v35 = vmul.f32 -1.442695, %v1665_v31  ;;  %v2728_v41 = vmul.f32 -1.442695, %v1736_v36 }
 0x539   : > { %3373 = vpow2.f32 %v2726_v32 }
 0x53a   : > { %3375 = vpow2.f32 %v2727_v35 }
 0x53b   : > { %3377 = vpow2.f32 %v2728_v41 }
 0x53c   : > { %3379 = vtanh.f32 %v1734_v42 }
 0x543   : > { %v3374_v45 = vpop.eup %3373 }
 0x544   : > { %v3376_v48 = vpop.eup %3375  ;;  %v1741_v26 = vadd.f32 1.0, %v3374_v45 }
 0x545   : > { %v1747_v53 = vadd.f32 1.0, %v3376_v48  ;;  %v3378_v54 = vpop.eup %3377 }
 0x546   : > { %3381 = vrcp.f32 %v1741_v26  ;;  %v3380_v22 = vpop.eup %3379  ;;  %v1754_v39 = vadd.f32 1.0, %v3378_v54 }
 0x547   : > { %3383 = vrcp.f32 %v1747_v53 }
 0x548   : > { %3385 = vrcp.f32 %v1754_v39 }
 0x550   : > { %v3382_v57 = vpop.eup %3381 }
 0x551   : > { %v3384_v58 = vpop.eup %3383  ;;  %v1758_v59 = vmul.f32 %v3382_v57, %v3380_v22 }
 0x552   : > { %v1757_v60 = vmul.f32 %v3384_v58, %v4085_v17  ;;  %v3386_v7 = vpop.eup %3385  ;;  %v1792_v17 = vld [vmem:[#allocation4 + $0x25] ss:$8 sm:$0xf] }
 0x553   : > { %v1795_v25 = vcombine.low %v1790_v24, %v1792_v17 }
 0x554   : > { %v4129_v1 = vadd.f32 %v1758_v59, %v1757_v60 }
 0x555   : > { %v1802_v27 = vrot.slane %v1795_v25, %v3612_v21 }
 0x556   : > { %3387 = vtanh.f32 %v4129_v1 }
 0x557   : > { %v1803_v28 = vcombine.high %v1802_v27, %v1802_v27  ;;  %v1810_v31 = vrot.slane %v1802_v27, %v3612_v21 }
 0x559   : > { %v1817_v6 = vrot.slane %v1803_v28, %v3612_v21  ;;  %v1818_v26 = vcombine.high %v1810_v31, %v1810_v31 }
 0x560   : > { %v3388_v8 = vpop.eup %3387 }
 0x561   : > { %v1761_v16 = vmul.f32 %v3388_v8, %v3386_v7 }
 0x563   : > { %v1769_v18 = vrot.slane %v1761_v16, %v3612_v21  ;;  %1889 = vmatmul.mubr.f32.vlgmr.msra.gmra.mrb[14].mxu0 %v1761_v16  ;;  %1960 = vmatmul.mubr.f32.vlgmr.msra.gmra.mrb[14].mxu1 %v1761_v16 }
 0x564   : > { %3139 = vmatpush1.bf16.msra.mxu0 %v3649_v37  ;;  %3171 = vmatpush1.bf16.msra.mxu1 %v3651_v38 }
 0x565   : > { %v1770_v23 = vcombine.high %v1769_v18, %v1769_v18  ;;  %2729 = vst.sshfl [vmem:[%s3573_s19 + $0x4] sm:$0x1 pattern:$0x73625140] %v1769_v18  ;;  %3141 = vmatprep.subr.bf16.mxu0 %v3668_v46  ;;  %3173 = vmatprep.subr.bf16.mxu1 %v3670_v47 }
 0x566   : > { %2116 = vmatprep.mubr.f32.mxu0 %v3478_v9  ;;  %2187 = vmatprep.mubr.f32.mxu1 %v3478_v9 }
 0x567   : > { %2730 = vst.sshfl [vmem:[%s3573_s19 + $0xc] sm:$0x1 pattern:$0x73625140] %v1770_v23 }
 0x568   : > { %3143 = vmatpush1.bf16.msra.mxu0 %v3689_v51  ;;  %3175 = vmatpush1.bf16.msra.mxu1 %v3691_v52 }
 0x569   : > { %3145 = vmatprep.subr.bf16.mxu0 %v3701_v55  ;;  %3177 = vmatprep.subr.bf16.mxu1 %v3703_v56 }
 0x56c   : > { %3147 = vmatpush1.bf16.msra.mxu0 %v3729_v63  ;;  %3179 = vmatpush1.bf16.msra.mxu1 %v3731_v0 }
 0x56d   : > { %3149 = vmatprep.subr.bf16.mxu0 %v3741_v3  ;;  %3181 = vmatprep.subr.bf16.mxu1 %v3743_v4 }
 0x570   : > { %3151 = vmatpush1.bf16.msra.mxu0 %v3767_v12  ;;  %3183 = vmatpush1.bf16.msra.mxu1 %v3769_v15 }
 0x571   : > { %3153 = vmatprep.subr.bf16.mxu0 %v3779_v19  ;;  %3185 = vmatprep.subr.bf16.mxu1 %v3781_v20 }
 0x574   : > { %3155 = vmatpush1.bf16.msra.mxu0 %v3803_v29  ;;  %3187 = vmatpush1.bf16.msra.mxu1 %v3805_v30 }
 0x575   : > { %3157 = vmatprep.subr.bf16.mxu0 %v3815_v33  ;;  %3189 = vmatprep.subr.bf16.mxu1 %v3817_v34 }
 0x578   : > { %3159 = vmatpush1.bf16.msra.mxu0 %v3839_v43  ;;  %3191 = vmatpush1.bf16.msra.mxu1 %v3841_v44 }
 0x579   : > { %3161 = vmatprep.subr.bf16.mxu0 %v3851_v49  ;;  %3193 = vmatprep.subr.bf16.mxu1 %v3853_v50 }
 0x57c   : > { %3163 = vmatpush1.bf16.msra.mxu0 %v3875_v61  ;;  %3195 = vmatpush1.bf16.msra.mxu1 %v3877_v62 }
 0x57d   : > { %3165 = vmatprep.subr.bf16.mxu0 %v3884_v2  ;;  %3197 = vmatprep.subr.bf16.mxu1 %v3886_v5 }
 0x580   : > { %3167 = vmatpush1.bf16.msra.mxu0 %v3899_v10  ;;  %3199 = vmatpush1.bf16.msra.mxu1 %v3901_v11 }
 0x581   : > { %3201 = vmatprep.subr.bf16.mxu0 %v3596_v13  ;;  %3233 = vmatprep.subr.bf16.mxu1 %v3598_v14  ;;  %v1819_v14 = vcombine.high %v1817_v6, %v1817_v6 }
 0x636   : > { %v1890_v32 = vpop.f32.mrb[14].mxu0  ;;  %v1961_v35 = vpop.f32.mrb[14].mxu1 }
 0x637   : > { %v1891_v36 = vadd.f32 %v1890_v32, %v1810_v31  ;;  %v1892_v40 = vpop.f32.mrb[15].mxu0  ;;  %v1963_v41 = vpop.f32.mrb[15].mxu1  ;;  %v1962_v54 = vadd.f32 %v1961_v35, %v1818_v26 }
 0x638   : > { %v1893_v42 = vadd.f32 %v1892_v40, %v1817_v6  ;;  %v1964_v48 = vadd.f32 %v1963_v41, %v1819_v14  ;;  %v2248_v41 = vld [vmem:[#allocation4 + $0x27] ss:$8 sm:$0xf] }
 0x639   : > { %v2731_v45 = vmul.f32 -1.442695, %v1891_v36 }
 0x63a   : > { %v2732_v13 = vmul.f32 -1.442695, %v1893_v42  ;;  %v2733_v53 = vmul.f32 -1.442695, %v1964_v48 }
 0x63b   : > { %3389 = vpow2.f32 %v2731_v45  ;;  %v2246_v42 = vld [vmem:[#allocation4 + $0x7] ss:$8 sm:$0xf] }
 0x63c   : > { %3391 = vpow2.f32 %v2732_v13  ;;  %v2251_v45 = vcombine.low %v2246_v42, %v2248_v41 }
 0x63d   : > { %3393 = vpow2.f32 %v2733_v53 }
 0x63e   : > { %3395 = vtanh.f32 %v1962_v54  ;;  %v2258_v13 = vrot.slane %v2251_v45, %v3612_v21 }
 0x640   : > { %v2259_v14 = vcombine.high %v2258_v13, %v2258_v13  ;;  %v2266_v48 = vrot.slane %v2258_v13, %v3612_v21 }
 0x642   : > { %v2273_v54 = vrot.slane %v2259_v14, %v3612_v21 }
 0x645   : > { %v3390_v22 = vpop.eup %3389 }
 0x646   : > { %v3392_v57 = vpop.eup %3391  ;;  %v1969_v58 = vadd.f32 1.0, %v3390_v22 }
 0x647   : > { %v1975_v59 = vadd.f32 1.0, %v3392_v57  ;;  %v3394_v39 = vpop.eup %3393 }
 0x648   : > { %3397 = vrcp.f32 %v1969_v58  ;;  %v3396_v60 = vpop.eup %3395  ;;  %v1982_v18 = vadd.f32 1.0, %v3394_v39 }
 0x649   : > { %3399 = vrcp.f32 %v1975_v59 }
 0x64a   : > { %3401 = vrcp.f32 %v1982_v18 }
 0x652   : > { %v3398_v7 = vpop.eup %3397 }
 0x653   : > { %v3400_v8 = vpop.eup %3399  ;;  %v1986_v16 = vmul.f32 %v3398_v7, %v3396_v60  ;;  %v2275_v7 = vcombine.high %v2273_v54, %v2273_v54 }
 0x654   : > { %v1985_v23 = vmul.f32 %v3400_v8, %v4129_v1  ;;  %v3402_v24 = vpop.eup %3401 }
 0x656   : > { %v4173_v17 = vadd.f32 %v1986_v16, %v1985_v23  ;;  %v2274_v16 = vcombine.high %v2266_v48, %v2266_v48 }
 0x658   : > { %3403 = vtanh.f32 %v4173_v17 }
 0x662   : > { %v3404_v25 = vpop.eup %3403 }
 0x663   : > { %v1989_v27 = vmul.f32 %v3404_v25, %v3402_v24 }
 0x665   : > { %v1997_v28 = vrot.slane %v1989_v27, %v3612_v21  ;;  %2117 = vmatmul.mubr.f32.vlgmr.msra.gmra.mrb[16].mxu0 %v1989_v27  ;;  %2188 = vmatmul.mubr.f32.vlgmr.msra.gmra.mrb[16].mxu1 %v1989_v27 }
 0x666   : > { %3203 = vmatpush1.bf16.msra.mxu0 %v3649_v37  ;;  %3235 = vmatpush1.bf16.msra.mxu1 %v3651_v38  ;;  %v2018_v37 = vld [vmem:[#allocation4 + $0x6] ss:$8 sm:$0xf] }
 0x667   : > { %v1998_v31 = vcombine.high %v1997_v28, %v1997_v28  ;;  %2734 = vst.sshfl [vmem:[%s3573_s19 + $0x5] sm:$0x1 pattern:$0x73625140] %v1997_v28  ;;  %3205 = vmatprep.subr.bf16.mxu0 %v3668_v46  ;;  %3237 = vmatprep.subr.bf16.mxu1 %v3670_v47 }
 0x668   : > { %2344 = vmatprep.mubr.f32.mxu0 %v3478_v9  ;;  %2415 = vmatprep.mubr.f32.mxu1 %v3478_v9  ;;  %v2020_v9 = vld [vmem:[#allocation4 + $0x26] ss:$8 sm:$0xf] }
 0x669   : > { %2735 = vst.sshfl [vmem:[%s3573_s19 + $0xd] sm:$0x1 pattern:$0x73625140] %v1998_v31  ;;  %v2023_v38 = vcombine.low %v2018_v37, %v2020_v9 }
 0x66a   : > { %3207 = vmatpush1.bf16.msra.mxu0 %v3689_v51  ;;  %3239 = vmatpush1.bf16.msra.mxu1 %v3691_v52 }
 0x66b   : > { %3209 = vmatprep.subr.bf16.mxu0 %v3701_v55  ;;  %3241 = vmatprep.subr.bf16.mxu1 %v3703_v56  ;;  %v2030_v46 = vrot.slane %v2023_v38, %v3612_v21 }
 0x66d   : > { %v2031_v47 = vcombine.high %v2030_v46, %v2030_v46  ;;  %v2038_v51 = vrot.slane %v2030_v46, %v3612_v21 }
 0x66e   : > { %3211 = vmatpush1.bf16.msra.mxu0 %v3729_v63  ;;  %3243 = vmatpush1.bf16.msra.mxu1 %v3731_v0 }
 0x66f   : > { %3213 = vmatprep.subr.bf16.mxu0 %v3741_v3  ;;  %3245 = vmatprep.subr.bf16.mxu1 %v3743_v4  ;;  %v2045_v56 = vrot.slane %v2031_v47, %v3612_v21 }
 0x672   : > { %3215 = vmatpush1.bf16.msra.mxu0 %v3767_v12  ;;  %3247 = vmatpush1.bf16.msra.mxu1 %v3769_v15 }
 0x673   : > { %3217 = vmatprep.subr.bf16.mxu0 %v3779_v19  ;;  %3249 = vmatprep.subr.bf16.mxu1 %v3781_v20  ;;  %v2047_v19 = vcombine.high %v2045_v56, %v2045_v56 }
 0x676   : > { %3219 = vmatpush1.bf16.msra.mxu0 %v3803_v29  ;;  %3251 = vmatpush1.bf16.msra.mxu1 %v3805_v30  ;;  %v2046_v29 = vcombine.high %v2038_v51, %v2038_v51 }
 0x677   : > { %3221 = vmatprep.subr.bf16.mxu0 %v3815_v33  ;;  %3253 = vmatprep.subr.bf16.mxu1 %v3817_v34 }
 0x67a   : > { %3223 = vmatpush1.bf16.msra.mxu0 %v3839_v43  ;;  %3255 = vmatpush1.bf16.msra.mxu1 %v3841_v44 }
 0x67b   : > { %3225 = vmatprep.subr.bf16.mxu0 %v3851_v49  ;;  %3257 = vmatprep.subr.bf16.mxu1 %v3853_v50 }
 0x67e   : > { %3227 = vmatpush1.bf16.msra.mxu0 %v3875_v61  ;;  %3259 = vmatpush1.bf16.msra.mxu1 %v3877_v62 }
 0x67f   : > { %3229 = vmatprep.subr.bf16.mxu0 %v3884_v2  ;;  %3261 = vmatprep.subr.bf16.mxu1 %v3886_v5 }
 0x682   : > { %3231 = vmatpush1.bf16.msra.mxu0 %v3899_v10  ;;  %3263 = vmatpush1.bf16.msra.mxu1 %v3901_v11 }
 0x738   : > { %v2118_v52 = vpop.f32.mrb[16].mxu0  ;;  %v2189_v55 = vpop.f32.mrb[16].mxu1 }
 0x739   : > { %v2119_v63 = vadd.f32 %v2118_v52, %v2038_v51  ;;  %v2120_v0 = vpop.f32.mrb[17].mxu0  ;;  %v2191_v3 = vpop.f32.mrb[17].mxu1  ;;  %v2190_v33 = vadd.f32 %v2189_v55, %v2046_v29 }
 0x73a   : > { %v2121_v4 = vadd.f32 %v2120_v0, %v2045_v56  ;;  %v2192_v20 = vadd.f32 %v2191_v3, %v2047_v19  ;;  %v2520_v3 = vld [vmem:[%s3570_s18] sm:$0xff] (%p3550_p6) }
 0x73b   : > { %v2736_v12 = vmul.f32 -1.442695, %v2119_v63  ;;  %2521 = vst [vmem:[%s2490_s9] sm:$0xff] (%p3550_p6), %v2520_v3 }
 0x73c   : > { %v2737_v15 = vmul.f32 -1.442695, %v2121_v4  ;;  %v2738_v30 = vmul.f32 -1.442695, %v2192_v20  ;;  %v2522_v4 = vld [vmem:[%s3570_s18 + $0x8] sm:$0xff] (%p3550_p6) }
 0x73d   : > { %3405 = vpow2.f32 %v2736_v12  ;;  %2523 = vst [vmem:[%s2490_s9 + $0x10] sm:$0xff] (%p3550_p6), %v2522_v4 }
 0x73e   : > { %3407 = vpow2.f32 %v2737_v15 }
 0x73f   : > { %3409 = vpow2.f32 %v2738_v30 }
 0x740   : > { %3411 = vtanh.f32 %v2190_v33 }
 0x747   : > { %v3406_v34 = vpop.eup %3405 }
 0x748   : > { %v3408_v43 = vpop.eup %3407  ;;  %v2197_v44 = vadd.f32 1.0, %v3406_v34 }
 0x749   : > { %v2203_v49 = vadd.f32 1.0, %v3408_v43  ;;  %v3410_v50 = vpop.eup %3409 }
 0x74a   : > { %3413 = vrcp.f32 %v2197_v44  ;;  %v3412_v61 = vpop.eup %3411  ;;  %v2210_v10 = vadd.f32 1.0, %v3410_v50 }
 0x74b   : > { %3415 = vrcp.f32 %v2203_v49 }
 0x74c   : > { %3417 = vrcp.f32 %v2210_v10 }
 0x754   : > { %v3414_v62 = vpop.eup %3413 }
 0x755   : > { %v3416_v2 = vpop.eup %3415  ;;  %v2214_v5 = vmul.f32 %v3414_v62, %v3412_v61 }
 0x756   : > { %v2213_v11 = vmul.f32 %v3416_v2, %v4173_v17  ;;  %v3418_v32 = vpop.eup %3417 }
 0x758   : > { %v2215_v1 = vadd.f32 %v2214_v5, %v2213_v11 }
 0x75a   : > { %3419 = vtanh.f32 %v2215_v1 }
 0x764   : > { %v3420_v35 = vpop.eup %3419 }
 0x765   : > { %v2217_v6 = vmul.f32 %v3420_v35, %v3418_v32 }
 0x767   : > { %v2225_v36 = vrot.slane %v2217_v6, %v3612_v21  ;;  %2345 = vmatmul.mubr.f32.vlgmr.msra.gmra.mrb[18].mxu0 %v2217_v6  ;;  %2416 = vmatmul.mubr.f32.vlgmr.msra.gmra.mrb[18].mxu1 %v2217_v6 }
 0x769   : > { %v2226_v40 = vcombine.high %v2225_v36, %v2225_v36  ;;  %2739 = vst.sshfl [vmem:[%s3573_s19 + $0x6] sm:$0x1 pattern:$0x73625140] %v2225_v36 }
 0x76b   : > { %2740 = vst.sshfl [vmem:[%s3573_s19 + $0xe] sm:$0x1 pattern:$0x73625140] %v2226_v40 }
 0x83a   : > { %v2346_v26 = vpop.f32.mrb[18].mxu0  ;;  %v2417_v53 = vpop.f32.mrb[18].mxu1 }
 0x83b   : > { %v2347_v22 = vadd.f32 %v2346_v26, %v2266_v48  ;;  %v2348_v57 = vpop.f32.mrb[19].mxu0  ;;  %v2419_v58 = vpop.f32.mrb[19].mxu1  ;;  %v2418_v23 = vadd.f32 %v2417_v53, %v2274_v16 }
 0x83c   : > { %v2349_v59 = vadd.f32 %v2348_v57, %v2273_v54  ;;  %v2420_v8 = vadd.f32 %v2419_v58, %v2275_v7 }
 0x83d   : > { %v2741_v39 = vmul.f32 -1.442695, %v2347_v22 }
 0x83e   : > { %v2742_v60 = vmul.f32 -1.442695, %v2349_v59  ;;  %v2743_v18 = vmul.f32 -1.442695, %v2420_v8 }
 0x83f   : > { %3421 = vpow2.f32 %v2741_v39 }
 0x840   : > { %3423 = vpow2.f32 %v2742_v60 }
 0x841   : > { %3425 = vpow2.f32 %v2743_v18 }
 0x842   : > { %3427 = vtanh.f32 %v2418_v23 }
 0x849   : > { %v3422_v17 = vpop.eup %3421 }
 0x84a   : > { %v3424_v24 = vpop.eup %3423  ;;  %v2425_v25 = vadd.f32 1.0, %v3422_v17 }
 0x84b   : > { %v2431_v27 = vadd.f32 1.0, %v3424_v24  ;;  %v3426_v28 = vpop.eup %3425 }
 0x84c   : > { %3429 = vrcp.f32 %v2425_v25  ;;  %v3428_v31 = vpop.eup %3427  ;;  %v2438_v46 = vadd.f32 1.0, %v3426_v28 }
 0x84d   : > { %3431 = vrcp.f32 %v2431_v27 }
 0x84e   : > { %3433 = vrcp.f32 %v2438_v46 }
 0x856   : > { %v3430_v9 = vpop.eup %3429 }
 0x857   : > { %v3432_v37 = vpop.eup %3431  ;;  %v2442_v38 = vmul.f32 %v3430_v9, %v3428_v31 }
 0x858   : > { %v2441_v47 = vmul.f32 %v3432_v37, %v2215_v1  ;;  %v3434_v52 = vpop.eup %3433 }
 0x85a   : > { %v2443_v51 = vadd.f32 %v2442_v38, %v2441_v47 }
 0x85c   : > { %3435 = vtanh.f32 %v2443_v51  ;;  %2474 = vst [vmem:[#allocation3] sm:$0x3] %v2443_v51 }
 0x866   : > { %v3436_v55 = vpop.eup %3435 }
 0x867   : > { %v2445_v56 = vmul.f32 %v3436_v55, %v3434_v52  ;;  %2485 = sbr.rel (!%p3550_p6) target bundleno = 2158 (0x86e), region = 86 }
 0x869   : > { %v2453_v63 = vrot.slane %v2445_v56, %v3612_v21  ;;  %2473 = vst [vmem:[#allocation2] sm:$0x3] %v2445_v56 }
 0x86b   : > { %v2454_v0 = vcombine.high %v2453_v63, %v2453_v63  ;;  %2744 = vst.sshfl [vmem:[%s3573_s19 + $0x7] sm:$0x1 pattern:$0x73625140] %v2453_v63 }
 0x86d   : > { %2745 = vst.sshfl [vmem:[%s3573_s19 + $0xf] sm:$0x1 pattern:$0x73625140] %v2454_v0 }
 0x86e PF: > { %2529 = sbr.rel (!%p3550_p6) target bundleno = 2166 (0x876), region = 124  ;;  %s2749_s10 = sshll.u32 (%p3550_p6), %s3467_s23, 3 }
 0x86f   : > { %s2534_s18 = scalar_lea.vmem (%p3550_p6), %s4261_s6, %s2749_s10 }
 0x872   : > { %v2564_v21 = vld [vmem:[%s3573_s19] sm:$0xff] (%p3550_p6) }
 0x873   : > { %2565 = vst [vmem:[%s2534_s18] sm:$0xff] (%p3550_p6), %v2564_v21 }
 0x874   : > { %v2566_v12 = vld [vmem:[%s3573_s19 + $0x8] sm:$0xff] (%p3550_p6) }
 0x875   : > { %2567 = vst [vmem:[%s2534_s18 + $0x10] sm:$0xff] %v2566_v12 }
 0x876 PF: > { %s17_s25 = sadd.s32 1, %s3475_s25   ;;  %s4263_s21 = smov %s3463_s22 }
 0x877   : > { %p14_p12 = scmp.ge.s32.totalorder %s17_s25, 4   ;;  %s4264_s22 = smov %s3555_s7 }
 0x878   : > { %s4265_s23 = smov %s3471_s24  ;;  %s4266_s24 = smov %s4268_s26 }
 0x879   :  { %16 = sbr.rel (!%p14_p12) target bundleno = 3 (0x3), region = 223 }

</bundles_post_ra>
